<compile_context>
chip_gen: v5e
topology: v5e:2x2
jax: 0.10.0
libtpu: 0.0.40
codegen_flags: <defaults>
</compile_context>

<pallas_src>
import functools

import jax
import jax.numpy as jnp
from jax import lax
from jax.experimental import pallas as pl
from jax.experimental.pallas import tpu as pltpu

IN_CH = 128        # in_channels      (module default)
DEC_CH = 128       # decode_channels  (module default)
EPS_WF = 1e-8      # WF eps
EPS_BN = 1e-5      # BatchNorm2d eps


# ============================ the fused Pallas kernel ===========================
def _wf_kernel(res_ref, x_ref, wpre_ref, u2_ref, wdw_ref, bdw_ref, o_ref, pad_ref,
               *, H1, W1, H2, W2, Cin, C):
    # ---- 1x1 pre_conv on res (fuse weight fw0 already folded into wpre) --- MXU
    pre = jnp.dot(res_ref[0].reshape(H2 * W2, Cin), wpre_ref[...],
                  preferred_element_type=jnp.float32)             # (H2*W2, C)

    # ---- bilinear 2x upsample of x as one matmul (fw1 folded into u2) ----- MXU
    xup = jnp.dot(u2_ref[...], x_ref[0].reshape(H1 * W1, C),
                  preferred_element_type=jnp.float32)             # (H2*W2, C)

    fused = (pre + xup).reshape(H2, W2, C)                        # fw0*pre + fw1*up

    # ---- depthwise 3x3 conv (WTConv2d base path) + folded BN + ReLU6 ------ VPU
    pad_ref[...] = jnp.zeros_like(pad_ref)                        # zero halo
    pad_ref[pl.ds(1, H2), pl.ds(1, W2), :] = fused

    wdw = wdw_ref[...]                                            # (9, C)
    acc = jnp.zeros((H2, W2, C), jnp.float32)
    for kh in range(3):
        for kw in range(3):
            acc = acc + pad_ref[pl.ds(kh, H2), pl.ds(kw, W2), :] * wdw[kh * 3 + kw]
    acc = acc + bdw_ref[0]                                        # folded BN bias
    o_ref[0] = jnp.clip(acc, 0.0, 6.0).astype(o_ref.dtype)        # ReLU6


# ================================ JAX wrapper ==================================
def bilinear_matrix(n_in, n_out):
    """Row-stochastic (n_out, n_in) matrix reproducing PyTorch bilinear upsample
    (align_corners=False, scale = n_out / n_in)."""
    scale = n_in / n_out
    i = jnp.arange(n_out, dtype=jnp.float32)
    src = jnp.maximum((i + 0.5) * scale - 0.5, 0.0)     # PyTorch clamps src < 0 to 0
    i0 = jnp.clip(jnp.floor(src).astype(jnp.int32), 0, n_in - 1)
    i1 = jnp.clip(i0 + 1, 0, n_in - 1)
    frac = src - i0.astype(jnp.float32)
    rows = jnp.arange(n_out)
    u = jnp.zeros((n_out, n_in), jnp.float32)
    u = u.at[rows, i0].add(1.0 - frac)
    u = u.at[rows, i1].add(frac)
    return u


def wf_forward(x, res, params):
    """x: (B, DEC_CH, H1, W1) NCHW; res: (B, IN_CH, 2*H1, 2*W1) NCHW -> NCHW out."""
    B, Cd, H1, W1 = x.shape
    _, Cin, H2, W2 = res.shape
    assert H2 == 2 * H1 and W2 == 2 * W1

    # fuse weights: relu + normalize (2 scalars) -> folded into the GEMM weights.
    w = jax.nn.relu(params["fuse_weights"])
    fw = w / (jnp.sum(w) + EPS_WF)

    # pre_conv 1x1 (bias=False): (Cout, Cin, 1, 1) -> (Cin, Cout), scaled by fw0.
    wpre = jnp.transpose(params["pre_conv_w"][:, :, 0, 0], (1, 0)) * fw[0]

    # bilinear 2x upsample as a single (H2*W2, H1*W1) matrix, scaled by fw1.
    uh = bilinear_matrix(H1, H2)
    uw = bilinear_matrix(W1, W2)
    u2 = jnp.einsum("ip,jq->ijpq", uh, uw).reshape(H2 * W2, H1 * W1) * fw[1]

    # depthwise 3x3 conv with the following BatchNorm folded in (exact).
    s = params["bn_gamma"] / jnp.sqrt(params["bn_var"] + EPS_BN)
    wdw = (params["dw_w"] * s[None, None, :]).reshape(9, Cd)       # (9, C)
    bdw = (params["bn_beta"] - params["bn_mean"] * s).reshape(1, Cd)

    # NCHW -> NHWC (channels on the lane dim).
    res_nhwc = jnp.transpose(res, (0, 2, 3, 1))
    x_nhwc = jnp.transpose(x, (0, 2, 3, 1))

    kernel = functools.partial(_wf_kernel, H1=H1, W1=W1, H2=H2, W2=W2,
                               Cin=Cin, C=Cd)
    out_nhwc = pl.pallas_call(
        kernel,
        out_shape=jax.ShapeDtypeStruct((B, H2, W2, Cd), jnp.float32),
        grid_spec=pltpu.PrefetchScalarGridSpec(
            num_scalar_prefetch=0,
            grid=(B,),
            in_specs=[
                pl.BlockSpec((1, H2, W2, Cin), lambda b: (b, 0, 0, 0)),
                pl.BlockSpec((1, H1, W1, Cd), lambda b: (b, 0, 0, 0)),
                pl.BlockSpec((Cin, Cd), lambda b: (0, 0)),
                pl.BlockSpec((H2 * W2, H1 * W1), lambda b: (0, 0)),
                pl.BlockSpec((9, Cd), lambda b: (0, 0)),
                pl.BlockSpec((1, Cd), lambda b: (0, 0)),
            ],
            out_specs=pl.BlockSpec((1, H2, W2, Cd), lambda b: (b, 0, 0, 0)),
            scratch_shapes=[pltpu.VMEM((H2 + 2, W2 + 2, Cd), jnp.float32)],
        ),
        compiler_params=pltpu.CompilerParams(dimension_semantics=("parallel",)),
    )(res_nhwc, x_nhwc, wpre, u2, wdw, bdw)

    return jnp.transpose(out_nhwc, (0, 3, 1, 2))


# =========================== pure-JAX reference (check) ========================
def wf_reference(x, res, params):
    B, Cd, H1, W1 = x.shape
    _, Cin, H2, W2 = res.shape
    w = jax.nn.relu(params["fuse_weights"])
    fw = w / (jnp.sum(w) + EPS_WF)

    uh = bilinear_matrix(H1, H2)
    uw = bilinear_matrix(W1, W2)
    xup = jnp.einsum("ip,jq,bcpq->bcij", uh, uw, x, precision=lax.Precision.HIGHEST)
    pre = jnp.einsum("oc,bchw->bohw", params["pre_conv_w"][:, :, 0, 0], res,
                     precision=lax.Precision.HIGHEST)
    fused = fw[0] * pre + fw[1] * xup

    dw = jnp.transpose(params["dw_w"], (2, 0, 1))[:, None, :, :]     # (C,1,3,3)
    y = lax.conv_general_dilated(fused, dw, (1, 1), [(1, 1), (1, 1)],
                                 dimension_numbers=("NCHW", "OIHW", "NCHW"),
                                 feature_group_count=Cd,
                                 precision=lax.Precision.HIGHEST)
    s = params["bn_gamma"] / jnp.sqrt(params["bn_var"] + EPS_BN)
    t = params["bn_beta"] - params["bn_mean"] * s
    y = y * s[None, :, None, None] + t[None, :, None, None]
    return jnp.clip(y, 0.0, 6.0)


# ============================ deterministic parameters =========================
def init_params(key, cin=IN_CH, cd=DEC_CH):
    k = jax.random.split(key, 2)
    idx = jnp.arange(cd, dtype=jnp.float32)
    return dict(
        fuse_weights=jnp.ones((2,), jnp.float32),        # nn.Parameter(torch.ones(2))
        pre_conv_w=0.05 * jax.random.normal(k[0], (cd, cin, 1, 1), jnp.float32),
        dw_w=0.1 * jax.random.normal(k[1], (3, 3, cd), jnp.float32),
        bn_gamma=1.0 + 0.01 * idx,
        bn_beta=0.02 * jnp.cos(idx),
        bn_mean=0.01 * jnp.sin(idx),
        bn_var=1.0 + 0.05 * jnp.mod(idx, 3.0),
    )


# ==================================== main =====================================
if __name__ == "__main__":
    B, H1, W1 = 2, 8, 8
    H2, W2 = 2 * H1, 2 * W1
    kx, kr, kp = jax.random.split(jax.random.PRNGKey(0), 3)
    x = jax.random.normal(kx, (B, DEC_CH, H1, W1), jnp.float32)     # decoder feature
    res = jax.random.normal(kr, (B, IN_CH, H2, W2), jnp.float32)    # skip connection
    params = init_params(kp)

    out = jax.jit(wf_forward)(x, res, params)
    out = jax.block_until_ready(out)
    assert out.shape == (B, DEC_CH, H2, W2) and out.dtype == jnp.float32
    assert bool(jnp.all(jnp.isfinite(out)))

    ref = wf_reference(x, res, params)
    max_err = float(jnp.max(jnp.abs(out - ref)))
    assert max_err < 5e-3, f"mismatch vs reference: max abs err = {max_err}"
    print("KERNEL_OK")
</pallas_src>

<mosaic_0001>
module attributes {stable_mosaic.version = 11 : i64} {
  func.func @_wf_kernel(%arg0: i32, %arg1: memref<1x16x16x128xf32, #tpu.memory_space<vmem>>, %arg2: memref<1x8x8x128xf32, #tpu.memory_space<vmem>>, %arg3: memref<128x128xf32, #tpu.memory_space<vmem>>, %arg4: memref<256x64xf32, #tpu.memory_space<vmem>>, %arg5: memref<9x128xf32, #tpu.memory_space<vmem>>, %arg6: memref<1x128xf32, #tpu.memory_space<vmem>>, %arg7: memref<1x16x16x128xf32, #tpu.memory_space<vmem>>, %arg8: memref<18x18x128xf32, #tpu.memory_space<vmem>>) attributes {dimension_semantics = [#tpu.dimension_semantics<parallel>], iteration_bounds = array<i64: 2>, scalar_prefetch = 0 : i64, scratch_operands = 1 : i64, tpu.core_type = #tpu.core_type<tc>, window_params = [{transform_indices = @transform_0, window_bounds = array<i64: 1, 16, 16, 128>}, {transform_indices = @transform_1, window_bounds = array<i64: 1, 8, 8, 128>}, {pipeline_mode = #tpu.pipeline_mode<synchronous>, transform_indices = @transform_2, window_bounds = array<i64: 128, 128>}, {pipeline_mode = #tpu.pipeline_mode<synchronous>, transform_indices = @transform_3, window_bounds = array<i64: 256, 64>}, {pipeline_mode = #tpu.pipeline_mode<synchronous>, transform_indices = @transform_4, window_bounds = array<i64: 9, 128>}, {pipeline_mode = #tpu.pipeline_mode<synchronous>, transform_indices = @transform_5, window_bounds = array<i64: 1, 128>}, {transform_indices = @transform_6, window_bounds = array<i64: 1, 16, 16, 128>}]} {
    %c0 = arith.constant 0 : index
    %c0_0 = arith.constant 0 : index
    %c0_1 = arith.constant 0 : index
    %c0_2 = arith.constant 0 : index
    %0 = vector.load %arg1[%c0, %c0_0, %c0_1, %c0_2] : memref<1x16x16x128xf32, #tpu.memory_space<vmem>>, vector<1x16x16x128xf32>
    %1 = vector.shape_cast %0 : vector<1x16x16x128xf32> to vector<16x16x128xf32>
    %2 = vector.shape_cast %1 : vector<16x16x128xf32> to vector<256x128xf32>
    %c0_3 = arith.constant 0 : index
    %c0_4 = arith.constant 0 : index
    %3 = vector.load %arg3[%c0_3, %c0_4] : memref<128x128xf32, #tpu.memory_space<vmem>>, vector<128x128xf32>
    %cst = arith.constant dense<0.000000e+00> : vector<256x128xf32>
    %4 = tpu.matmul %2, %3, %cst {dimension_numbers = #tpu.dot_dimension_numbers<[1], [0], [0], [1], [0, 0, 1, 1], [], []>} : vector<256x128xf32>, vector<128x128xf32>, vector<256x128xf32> -> vector<256x128xf32>
    %c0_5 = arith.constant 0 : index
    %c0_6 = arith.constant 0 : index
    %5 = vector.load %arg4[%c0_5, %c0_6] : memref<256x64xf32, #tpu.memory_space<vmem>>, vector<256x64xf32>
    %c0_7 = arith.constant 0 : index
    %c0_8 = arith.constant 0 : index
    %c0_9 = arith.constant 0 : index
    %c0_10 = arith.constant 0 : index
    %6 = vector.load %arg2[%c0_7, %c0_8, %c0_9, %c0_10] : memref<1x8x8x128xf32, #tpu.memory_space<vmem>>, vector<1x8x8x128xf32>
    %7 = vector.shape_cast %6 : vector<1x8x8x128xf32> to vector<8x8x128xf32>
    %8 = vector.shape_cast %7 : vector<8x8x128xf32> to vector<64x128xf32>
    %cst_11 = arith.constant dense<0.000000e+00> : vector<256x128xf32>
    %9 = tpu.matmul %5, %8, %cst_11 {dimension_numbers = #tpu.dot_dimension_numbers<[1], [0], [0], [1], [0, 0, 1, 1], [], []>} : vector<256x64xf32>, vector<64x128xf32>, vector<256x128xf32> -> vector<256x128xf32>
    %10 = arith.addf %4, %9 : vector<256x128xf32>
    %11 = vector.shape_cast %10 : vector<256x128xf32> to vector<16x16x128xf32>
    %cst_12 = arith.constant 0.000000e+00 : f32
    %12 = vector.broadcast %cst_12 : f32 to vector<18x18x128xf32>
    %c0_13 = arith.constant 0 : index
    %c0_14 = arith.constant 0 : index
    %c0_15 = arith.constant 0 : index
    %13 = vector.load %arg8[%c0_13, %c0_14, %c0_15] : memref<18x18x128xf32, #tpu.memory_space<vmem>>, vector<18x18x128xf32>
    tpu.vector_store %arg8[%c0_13, %c0_14, %c0_15], %12 {strides = array<i32>} : memref<18x18x128xf32, #tpu.memory_space<vmem>>, vector<18x18x128xf32>,
    %c1 = arith.constant 1 : index
    %c1_16 = arith.constant 1 : index
    %c0_17 = arith.constant 0 : index
    %14 = vector.load %arg8[%c1, %c1_16, %c0_17] : memref<18x18x128xf32, #tpu.memory_space<vmem>>, vector<16x16x128xf32>
    tpu.vector_store %arg8[%c1, %c1_16, %c0_17], %11 {strides = array<i32>} : memref<18x18x128xf32, #tpu.memory_space<vmem>>, vector<16x16x128xf32>,
    %c0_18 = arith.constant 0 : index
    %c0_19 = arith.constant 0 : index
    %15 = vector.load %arg5[%c0_18, %c0_19] : memref<9x128xf32, #tpu.memory_space<vmem>>, vector<9x128xf32>
    %cst_20 = arith.constant 0.000000e+00 : f32
    %16 = vector.broadcast %cst_20 : f32 to vector<16x16x128xf32>
    %c0_21 = arith.constant 0 : index
    %c0_22 = arith.constant 0 : index
    %c0_23 = arith.constant 0 : index
    %17 = vector.load %arg8[%c0_21, %c0_22, %c0_23] : memref<18x18x128xf32, #tpu.memory_space<vmem>>, vector<16x16x128xf32>
    %18 = vector.extract_strided_slice %15 {offsets = [0, 0], sizes = [1, 128], strides = [1, 1]} : vector<9x128xf32> to vector<1x128xf32>
    %19 = vector.shape_cast %18 : vector<1x128xf32> to vector<128xf32>
    %20 = vector.shape_cast %19 : vector<128xf32> to vector<1x1x128xf32>
    %21 = vector.broadcast %20 : vector<1x1x128xf32> to vector<16x16x128xf32>
    %22 = arith.mulf %17, %21 : vector<16x16x128xf32>
    %23 = arith.addf %16, %22 : vector<16x16x128xf32>
    %c0_24 = arith.constant 0 : index
    %c1_25 = arith.constant 1 : index
    %c0_26 = arith.constant 0 : index
    %24 = vector.load %arg8[%c0_24, %c1_25, %c0_26] : memref<18x18x128xf32, #tpu.memory_space<vmem>>, vector<16x16x128xf32>
    %25 = vector.extract_strided_slice %15 {offsets = [1, 0], sizes = [1, 128], strides = [1, 1]} : vector<9x128xf32> to vector<1x128xf32>
    %26 = vector.shape_cast %25 : vector<1x128xf32> to vector<128xf32>
    %27 = vector.shape_cast %26 : vector<128xf32> to vector<1x1x128xf32>
    %28 = vector.broadcast %27 : vector<1x1x128xf32> to vector<16x16x128xf32>
    %29 = arith.mulf %24, %28 : vector<16x16x128xf32>
    %30 = arith.addf %23, %29 : vector<16x16x128xf32>
    %c0_27 = arith.constant 0 : index
    %c2 = arith.constant 2 : index
    %c0_28 = arith.constant 0 : index
    %31 = vector.load %arg8[%c0_27, %c2, %c0_28] : memref<18x18x128xf32, #tpu.memory_space<vmem>>, vector<16x16x128xf32>
    %32 = vector.extract_strided_slice %15 {offsets = [2, 0], sizes = [1, 128], strides = [1, 1]} : vector<9x128xf32> to vector<1x128xf32>
    %33 = vector.shape_cast %32 : vector<1x128xf32> to vector<128xf32>
    %34 = vector.shape_cast %33 : vector<128xf32> to vector<1x1x128xf32>
    %35 = vector.broadcast %34 : vector<1x1x128xf32> to vector<16x16x128xf32>
    %36 = arith.mulf %31, %35 : vector<16x16x128xf32>
    %37 = arith.addf %30, %36 : vector<16x16x128xf32>
    %c1_29 = arith.constant 1 : index
    %c0_30 = arith.constant 0 : index
    %c0_31 = arith.constant 0 : index
    %38 = vector.load %arg8[%c1_29, %c0_30, %c0_31] : memref<18x18x128xf32, #tpu.memory_space<vmem>>, vector<16x16x128xf32>
    %39 = vector.extract_strided_slice %15 {offsets = [3, 0], sizes = [1, 128], strides = [1, 1]} : vector<9x128xf32> to vector<1x128xf32>
    %40 = vector.shape_cast %39 : vector<1x128xf32> to vector<128xf32>
    %41 = vector.shape_cast %40 : vector<128xf32> to vector<1x1x128xf32>
    %42 = vector.broadcast %41 : vector<1x1x128xf32> to vector<16x16x128xf32>
    %43 = arith.mulf %38, %42 : vector<16x16x128xf32>
    %44 = arith.addf %37, %43 : vector<16x16x128xf32>
    %c1_32 = arith.constant 1 : index
    %c1_33 = arith.constant 1 : index
    %c0_34 = arith.constant 0 : index
    %45 = vector.load %arg8[%c1_32, %c1_33, %c0_34] : memref<18x18x128xf32, #tpu.memory_space<vmem>>, vector<16x16x128xf32>
    %46 = vector.extract_strided_slice %15 {offsets = [4, 0], sizes = [1, 128], strides = [1, 1]} : vector<9x128xf32> to vector<1x128xf32>
    %47 = vector.shape_cast %46 : vector<1x128xf32> to vector<128xf32>
    %48 = vector.shape_cast %47 : vector<128xf32> to vector<1x1x128xf32>
    %49 = vector.broadcast %48 : vector<1x1x128xf32> to vector<16x16x128xf32>
    %50 = arith.mulf %45, %49 : vector<16x16x128xf32>
    %51 = arith.addf %44, %50 : vector<16x16x128xf32>
    %c1_35 = arith.constant 1 : index
    %c2_36 = arith.constant 2 : index
    %c0_37 = arith.constant 0 : index
    %52 = vector.load %arg8[%c1_35, %c2_36, %c0_37] : memref<18x18x128xf32, #tpu.memory_space<vmem>>, vector<16x16x128xf32>
    %53 = vector.extract_strided_slice %15 {offsets = [5, 0], sizes = [1, 128], strides = [1, 1]} : vector<9x128xf32> to vector<1x128xf32>
    %54 = vector.shape_cast %53 : vector<1x128xf32> to vector<128xf32>
    %55 = vector.shape_cast %54 : vector<128xf32> to vector<1x1x128xf32>
    %56 = vector.broadcast %55 : vector<1x1x128xf32> to vector<16x16x128xf32>
    %57 = arith.mulf %52, %56 : vector<16x16x128xf32>
    %58 = arith.addf %51, %57 : vector<16x16x128xf32>
    %c2_38 = arith.constant 2 : index
    %c0_39 = arith.constant 0 : index
    %c0_40 = arith.constant 0 : index
    %59 = vector.load %arg8[%c2_38, %c0_39, %c0_40] : memref<18x18x128xf32, #tpu.memory_space<vmem>>, vector<16x16x128xf32>
    %60 = vector.extract_strided_slice %15 {offsets = [6, 0], sizes = [1, 128], strides = [1, 1]} : vector<9x128xf32> to vector<1x128xf32>
    %61 = vector.shape_cast %60 : vector<1x128xf32> to vector<128xf32>
    %62 = vector.shape_cast %61 : vector<128xf32> to vector<1x1x128xf32>
    %63 = vector.broadcast %62 : vector<1x1x128xf32> to vector<16x16x128xf32>
    %64 = arith.mulf %59, %63 : vector<16x16x128xf32>
    %65 = arith.addf %58, %64 : vector<16x16x128xf32>
    %c2_41 = arith.constant 2 : index
    %c1_42 = arith.constant 1 : index
    %c0_43 = arith.constant 0 : index
    %66 = vector.load %arg8[%c2_41, %c1_42, %c0_43] : memref<18x18x128xf32, #tpu.memory_space<vmem>>, vector<16x16x128xf32>
    %67 = vector.extract_strided_slice %15 {offsets = [7, 0], sizes = [1, 128], strides = [1, 1]} : vector<9x128xf32> to vector<1x128xf32>
    %68 = vector.shape_cast %67 : vector<1x128xf32> to vector<128xf32>
    %69 = vector.shape_cast %68 : vector<128xf32> to vector<1x1x128xf32>
    %70 = vector.broadcast %69 : vector<1x1x128xf32> to vector<16x16x128xf32>
    %71 = arith.mulf %66, %70 : vector<16x16x128xf32>
    %72 = arith.addf %65, %71 : vector<16x16x128xf32>
    %c2_44 = arith.constant 2 : index
    %c2_45 = arith.constant 2 : index
    %c0_46 = arith.constant 0 : index
    %73 = vector.load %arg8[%c2_44, %c2_45, %c0_46] : memref<18x18x128xf32, #tpu.memory_space<vmem>>, vector<16x16x128xf32>
    %74 = vector.extract_strided_slice %15 {offsets = [8, 0], sizes = [1, 128], strides = [1, 1]} : vector<9x128xf32> to vector<1x128xf32>
    %75 = vector.shape_cast %74 : vector<1x128xf32> to vector<128xf32>
    %76 = vector.shape_cast %75 : vector<128xf32> to vector<1x1x128xf32>
    %77 = vector.broadcast %76 : vector<1x1x128xf32> to vector<16x16x128xf32>
    %78 = arith.mulf %73, %77 : vector<16x16x128xf32>
    %79 = arith.addf %72, %78 : vector<16x16x128xf32>
    %c0_47 = arith.constant 0 : index
    %c0_48 = arith.constant 0 : index
    %80 = vector.load %arg6[%c0_47, %c0_48] : memref<1x128xf32, #tpu.memory_space<vmem>>, vector<1x128xf32>
    %81 = vector.shape_cast %80 : vector<1x128xf32> to vector<128xf32>
    %82 = vector.shape_cast %81 : vector<128xf32> to vector<1x1x128xf32>
    %83 = vector.broadcast %82 : vector<1x1x128xf32> to vector<16x16x128xf32>
    %84 = arith.addf %79, %83 : vector<16x16x128xf32>
    %cst_49 = arith.constant 0.000000e+00 : f32
    %cst_50 = arith.constant 6.000000e+00 : f32
    %85 = vector.broadcast %cst_49 : f32 to vector<16x16x128xf32>
    %86 = arith.maximumf %85, %84 : vector<16x16x128xf32>
    %87 = vector.broadcast %cst_50 : f32 to vector<16x16x128xf32>
    %88 = arith.minimumf %87, %86 : vector<16x16x128xf32>
    %c0_51 = arith.constant 0 : index
    %c0_52 = arith.constant 0 : index
    %c0_53 = arith.constant 0 : index
    %c0_54 = arith.constant 0 : index
    %89 = vector.load %arg7[%c0_51, %c0_52, %c0_53, %c0_54] : memref<1x16x16x128xf32, #tpu.memory_space<vmem>>, vector<1x16x16x128xf32>
    %90 = vector.shape_cast %89 : vector<1x16x16x128xf32> to vector<16x16x128xf32>
    %91 = vector.shape_cast %88 : vector<16x16x128xf32> to vector<1x16x16x128xf32>
    tpu.vector_store %arg7[%c0_51, %c0_52, %c0_53, %c0_54], %91 {strides = array<i32>} : memref<1x16x16x128xf32, #tpu.memory_space<vmem>>, vector<1x16x16x128xf32>,
    return
  }
  func.func @transform_0(%arg0: i32) -> (i32, i32, i32, i32) {
    %c0_i32 = arith.constant 0 : i32
    %c0_i32_0 = arith.constant 0 : i32
    %c0_i32_1 = arith.constant 0 : i32
    %c0_i32_2 = arith.constant 0 : i32
    return %arg0, %c0_i32, %c0_i32_0, %c0_i32_1 : i32, i32, i32, i32
  }
  func.func @transform_1(%arg0: i32) -> (i32, i32, i32, i32) {
    %c0_i32 = arith.constant 0 : i32
    %c0_i32_0 = arith.constant 0 : i32
    %c0_i32_1 = arith.constant 0 : i32
    %c0_i32_2 = arith.constant 0 : i32
    return %arg0, %c0_i32, %c0_i32_0, %c0_i32_1 : i32, i32, i32, i32
  }
  func.func @transform_2(%arg0: i32) -> (i32, i32) {
    %c0_i32 = arith.constant 0 : i32
    %c0_i32_0 = arith.constant 0 : i32
    %c0_i32_1 = arith.constant 0 : i32
    return %c0_i32, %c0_i32_0 : i32, i32
  }
  func.func @transform_3(%arg0: i32) -> (i32, i32) {
    %c0_i32 = arith.constant 0 : i32
    %c0_i32_0 = arith.constant 0 : i32
    %c0_i32_1 = arith.constant 0 : i32
    return %c0_i32, %c0_i32_0 : i32, i32
  }
  func.func @transform_4(%arg0: i32) -> (i32, i32) {
    %c0_i32 = arith.constant 0 : i32
    %c0_i32_0 = arith.constant 0 : i32
    %c0_i32_1 = arith.constant 0 : i32
    return %c0_i32, %c0_i32_0 : i32, i32
  }
  func.func @transform_5(%arg0: i32) -> (i32, i32) {
    %c0_i32 = arith.constant 0 : i32
    %c0_i32_0 = arith.constant 0 : i32
    %c0_i32_1 = arith.constant 0 : i32
    return %c0_i32, %c0_i32_0 : i32, i32
  }
  func.func @transform_6(%arg0: i32) -> (i32, i32, i32, i32) {
    %c0_i32 = arith.constant 0 : i32
    %c0_i32_0 = arith.constant 0 : i32
    %c0_i32_1 = arith.constant 0 : i32
    %c0_i32_2 = arith.constant 0 : i32
    return %arg0, %c0_i32, %c0_i32_0, %c0_i32_1 : i32, i32, i32, i32
  }
}

</mosaic_0001>

<bundles_post_ra>
// kernel: wf_forward.1
= control target key start
LH: loop header
LB: loop body
LE: loop exit
PB: predicated region body
PF: predicated region fallthrough
CT: control target
= control target key end

     0   :  { %11 = vsyncpa [#allocation4], 0  ;;  %s3321_s0 = inlined_call_operand.vmem [shape: f32[2,16,16,128], index: 0, kind: input, shape index: {}]   ;;  %s3322_s1 = inlined_call_operand.vmem [shape: f32[2,8,8,128], index: 1, kind: input, shape index: {}]   ;;  %s3323_s2 = inlined_call_operand.vmem [shape: f32[128,128], index: 2, kind: input, shape index: {}]   ;;  %s3324_s3 = inlined_call_operand.vmem [shape: f32[256,64], index: 3, kind: input, shape index: {}]   ;;  %s3325_s4 = inlined_call_operand.vmem [shape: f32[9,128], index: 4, kind: input, shape index: {}]   ;;  %s3326_s5 = inlined_call_operand.vmem [shape: f32[1,128], index: 5, kind: input, shape index: {}]   ;;  %s3327_s6 = inlined_call_operand.hbm [shape: f32[2,16,16,128], index: 6, kind: output, shape index: {}]  }
   0x1   :  { %13 = vsyncpa [#allocation4 + $0x1], 0  ;;  %s2104_s21 = smov 0   ;;  %s2106_s22 = smov 0  }
   0x2   :  { %s2108_s23 = smov 0   ;;  %s2110_s24 = smov 0  }
   0x3 LB: > { %s2125_s25 = sadd.s32 4294967295, %s2064_s24   ;;  %s1866_s26 = sadd.s32 4294967294, %s2064_s24   ;;  %s2064_s24 = sphi %s2110_s24, %s3395_s24   ;;  %s2060_s23 = sphi %s2108_s23, %s3394_s23   ;;  %s2056_s22 = sphi %s2106_s22, %s3393_s22   ;;  %s2052_s21 = sphi %s2104_s21, %s3392_s21  }
   0x4   : > { %s2129_s27 = sadd.s32 1, %s2064_s24   ;;  %s162_s28 = sadd.s32 1, %s2060_s23 }
   0x5   : > { %s159_s29 = ssub.s32 %s2064_s24, %s2129_s27  ;;  %p172_p0 = scmp.ne.s32.totalorder %s2060_s23, %s2056_s22 }
   0x6   : > { %p160_p1 = scmp.eq.s32.totalorder %s159_s29, 0  ;;  %p173_p2 = scmp.eq.s32.totalorder %s2125_s25, 1 }
   0x7   : > { %p178_p3 = scmp.ne.s32.totalorder %s2056_s22, %s2052_s21  ;;  %p179_p4 = scmp.eq.s32.totalorder %s1866_s26, 1 }
   0x8   : > { %s2140_s30 = scalar_select %p160_p1, %s2060_s23, %s162_s28  }
   0x9   : > { %p2142_p5 = por %p173_p2, %p172_p0  ;;  %p2146_p6 = por %p179_p4, %p178_p3 }
   0xa   : > { %p1869_p7 = scmp.ge.s32.totalorder %s2064_s24, 1  ;;  %p225_p8 = scmp.lt.s32.totalorder %s2064_s24, 3 }
   0xc   : > { %p226_p9 = pnand %p1869_p7, %p225_p8 }
   0xe   : > { %229 = sbr.rel (%p226_p9) target bundleno = 381 (0x17d), region = 44 }
  0x13   : > { %v2155_v0 = vld [vmem:[%s3323_s2 + $0x78] sm:$0xff]  ;;  %v2160_v1 = vld [vmem:[%s3323_s2 + $0x70] sm:$0xff]  ;;  %p260_p10 = scmp.lt.s32.totalorder %s2125_s25, 1  ;;  %v2168_v2 = vld [vmem:[%s3323_s2 + $0x68] sm:$0xff]  ;;  %vm358_vm0 = vcmask 523264   ;;  %s257_s26 = sand.u32 1, %s2056_s22  }
  0x14   : > { %568 = vmatpush.msra.mxu1 %v2155_v0  ;;  %1923 = vmatpush.msra.mxu2 %v2155_v0  ;;  %v2186_v3 = vld [vmem:[%s3323_s2 + $0x60] sm:$0xff]  ;;  %v2193_v6 = vld [vmem:[%s3323_s2 + $0x58] sm:$0xff]  ;;  %v2201_v8 = vld [vmem:[%s3323_s2 + $0x50] sm:$0xff]  ;;  %s1914_s12 = sshll.u32 %s2125_s25, 8  ;;  %s1777_s17 = scalar_lea.sflag [#allocation4], %s257_s26 }
  0x15   : > { %s2171_s15 = scalar_select %p260_p10, %s2125_s25, 1  ;;  %v2209_v10 = vld [vmem:[%s3323_s2 + $0x48] sm:$0xff]  ;;  %v2217_v12 = vld [vmem:[%s3323_s2 + $0x40] sm:$0xff]  ;;  %v2225_v14 = vld [vmem:[%s3323_s2 + $0x38] sm:$0xff] }
  0x16   : > { %569 = vmatpush.msra.mxu1 %v2160_v1  ;;  %1925 = vmatpush.msra.mxu2 %v2160_v1  ;;  %v308_v16 = vld [vmem:[%s3323_s2 + $0x30] sm:$0xff]  ;;  %v307_v18 = vld [vmem:[%s3323_s2 + $0x28] sm:$0xff]  ;;  %v318_v19 = vld [vmem:[%s3324_s3] sm:$0xff]  ;;  %s1788_s14 = scalar_lea.hbm %s3327_s6, %s1914_s12  ;;  %s2022_s10 = scalar_lea.hbm %s3327_s6, 512 }
  0x17   : > { %s1913_s16 = sshll.u32 %s2171_s15, 6  ;;  %v335_v20 = vld [vmem:[%s3324_s3 + $0x88] sm:$0xff]  ;;  %v306_v21 = vld [vmem:[%s3323_s2 + $0x20] sm:$0xff]  ;;  %v305_v22 = vld [vmem:[%s3323_s2 + $0x18] sm:$0xff] }
  0x18   : > { %570 = vmatpush.msra.mxu1 %v2168_v2  ;;  %1927 = vmatpush.msra.mxu2 %v2168_v2  ;;  %s2181_s19 = scalar_lea.vmem %s3322_s1, %s1913_s16  ;;  %s1912_s16 = sshll.u32 %s2171_s15, 8  ;;  %v304_v23 = vld [vmem:[%s3323_s2 + $0x10] sm:$0xff]  ;;  %v303_v24 = vld [vmem:[%s3323_s2 + $0x8] sm:$0xff]  ;;  %v302_v27 = vld [vmem:[%s3323_s2] sm:$0xff] }
  0x19   : > { %v357_v4 = vld [vmem:[%s2181_s19 + $0x38] sm:$0xff]  ;;  %v356_v5 = vld [vmem:[%s2181_s19 + $0x30] sm:$0xff]  ;;  %v355_v7 = vld [vmem:[%s2181_s19 + $0x28] sm:$0xff]  ;;  %s2262_s28 = scalar_lea.vmem %s3321_s0, %s1912_s16  ;;  %s2595_s15 = sshll.u32 %s257_s26, 8 }
  0x1a   : > { %463 = vmatpush.msra.mxu0 %v357_v4  ;;  %1915 = vmatpush.msra.mxu3 %v357_v4  ;;  %v354_v9 = vld [vmem:[%s2181_s19 + $0x20] sm:$0xff]  ;;  %v353_v11 = vld [vmem:[%s2181_s19 + $0x18] sm:$0xff]  ;;  %v352_v13 = vld [vmem:[%s2181_s19 + $0x10] sm:$0xff]  ;;  %s2634_s29 = scalar_lea.vmem [#allocation3], %s2595_s15  ;;  %s1791_s16 = sshll.u32 %s1788_s14, 4  ;;  %s1792_s16 = int_to_ptr.hbm [resolvable:$true] %s1791_s16 }
  0x1b   : > { %571 = vmatpush.msra.mxu1 %v2186_v3  ;;  %1929 = vmatpush.msra.mxu2 %v2186_v3  ;;  %v351_v15 = vld [vmem:[%s2181_s19 + $0x8] sm:$0xff]  ;;  %v350_v17 = vld [vmem:[%s2181_s19] sm:$0xff]  ;;  %v336_v26 = vld [vmem:[%s3324_s3 + $0x90] sm:$0xff]  ;;  %s1789_s25 = sshll.u32 %s2634_s29, 4  ;;  %s2016_s18 = sshra.s32 %s1792_s16, 4  ;;  %s1790_s25 = int_to_ptr.vmem [resolvable:$true] %s1789_s25  ;;  %s2017_s18 = int_to_ptr.hbm [resolvable:$true] %s2016_s18 }
  0x1c   : > { %464 = vmatpush.msra.mxu0 %v356_v5  ;;  %1916 = vmatpush.msra.mxu3 %v356_v5  ;;  %v319_v25 = vld [vmem:[%s3324_s3 + $0x8] sm:$0xff]  ;;  %v270_v28 = vld [vmem:[%s2262_s28] sm:$0xff]  ;;  %v285_v29 = vld [vmem:[%s2262_s28 + $0x78] sm:$0xff]  ;;  %s2018_s20 = scalar_lea.hbm %s2017_s18, 256  ;;  %p2023_p0 = scmp.lt.s32.totalorder %s2017_s18, %s3327_s6 }
  0x1d   : > { %572 = vmatpush.msra.mxu1 %v2193_v6  ;;  %1931 = vmatpush.msra.mxu2 %v2193_v6  ;;  %v320_v30 = vld [vmem:[%s3324_s3 + $0x10] sm:$0xff]  ;;  %v337_v31 = vld [vmem:[%s3324_s3 + $0x98] sm:$0xff]  ;;  %v271_v32 = vld [vmem:[%s2262_s28 + $0x8] sm:$0xff]  ;;  %p2019_p11 = scmp.ne.s32.totalorder %s2017_s18, %s2018_s20  ;;  %p2024_p1 = scmp.lt.s32.totalorder %s2022_s10, %s2018_s20 }
  0x1e   : > { %465 = vmatpush.msra.mxu0 %v355_v7  ;;  %1917 = vmatpush.msra.mxu3 %v355_v7  ;;  %v286_v33 = vld [vmem:[%s2262_s28 + $0x80] sm:$0xff]  ;;  %v321_v34 = vld [vmem:[%s3324_s3 + $0x18] sm:$0xff]  ;;  %v272_v36 = vld [vmem:[%s2262_s28 + $0x10] sm:$0xff] }
  0x1f   : > { %573 = vmatpush.msra.mxu1 %v2201_v8  ;;  %1933 = vmatpush.msra.mxu2 %v2201_v8  ;;  %v338_v35 = vld [vmem:[%s3324_s3 + $0xa0] sm:$0xff]  ;;  %v287_v37 = vld [vmem:[%s2262_s28 + $0x88] sm:$0xff]  ;;  %v273_v40 = vld [vmem:[%s2262_s28 + $0x18] sm:$0xff]  ;;  %p2020_p12 = pnand %p2019_p11, %p2142_p5  ;;  %p2025_p2 = por %p2024_p1, %p2023_p0 }
  0x20   : > { %466 = vmatpush.msra.mxu0 %v354_v9  ;;  %1918 = vmatpush.msra.mxu3 %v354_v9  ;;  %v322_v38 = vld [vmem:[%s3324_s3 + $0x20] sm:$0xff]  ;;  %v339_v39 = vld [vmem:[%s3324_s3 + $0xa8] sm:$0xff]  ;;  %v288_v41 = vld [vmem:[%s2262_s28 + $0x90] sm:$0xff] }
  0x21   : > { %574 = vmatpush.msra.mxu1 %v2209_v10  ;;  %1935 = vmatpush.msra.mxu2 %v2209_v10  ;;  %v323_v42 = vld [vmem:[%s3324_s3 + $0x28] sm:$0xff]  ;;  %v340_v43 = vld [vmem:[%s3324_s3 + $0xb0] sm:$0xff]  ;;  %v274_v44 = vld [vmem:[%s2262_s28 + $0x20] sm:$0xff]  ;;  %p2021_p13 = pneg %p2020_p12 }
  0x22   : > { %467 = vmatpush.msra.mxu0 %v353_v11  ;;  %1919 = vmatpush.msra.mxu3 %v353_v11  ;;  %v289_v45 = vld [vmem:[%s2262_s28 + $0x98] sm:$0xff]  ;;  %v324_v46 = vld [vmem:[%s3324_s3 + $0x30] sm:$0xff]  ;;  %v275_v48 = vld [vmem:[%s2262_s28 + $0x28] sm:$0xff] }
  0x23   : > { %575 = vmatpush.msra.mxu1 %v2217_v12  ;;  %1937 = vmatpush.msra.mxu2 %v2217_v12  ;;  %v341_v47 = vld [vmem:[%s3324_s3 + $0xb8] sm:$0xff]  ;;  %v290_v49 = vld [vmem:[%s2262_s28 + $0xa0] sm:$0xff]  ;;  %v276_v52 = vld [vmem:[%s2262_s28 + $0x30] sm:$0xff]  ;;  %p2026_p3 = pnand %p2025_p2, %p2021_p13 }
  0x24   : > { %468 = vmatpush.msra.mxu0 %v352_v13  ;;  %1920 = vmatpush.msra.mxu3 %v352_v13  ;;  %v325_v50 = vld [vmem:[%s3324_s3 + $0x38] sm:$0xff]  ;;  %v342_v51 = vld [vmem:[%s3324_s3 + $0xc0] sm:$0xff]  ;;  %v291_v53 = vld [vmem:[%s2262_s28 + $0xa8] sm:$0xff]  ;;  %v2066_v13 = vmov 0.0  }
  0x25   : > { %576 = vmatpush.msra.mxu1 %v2225_v14  ;;  %1939 = vmatpush.msra.mxu2 %v2225_v14  ;;  %v326_v54 = vld [vmem:[%s3324_s3 + $0x40] sm:$0xff]  ;;  %v343_v55 = vld [vmem:[%s3324_s3 + $0xc8] sm:$0xff]  ;;  %v277_v56 = vld [vmem:[%s2262_s28 + $0x38] sm:$0xff]  ;;  %681 = vst [vmem:[#allocation2] sm:$0xff] %v2066_v13 }
  0x26   : > { %469 = vmatpush.msra.mxu0 %v351_v15  ;;  %1921 = vmatpush.msra.mxu3 %v351_v15  ;;  %v292_v57 = vld [vmem:[%s2262_s28 + $0xb0] sm:$0xff]  ;;  %v327_v58 = vld [vmem:[%s3324_s3 + $0x48] sm:$0xff]  ;;  %v278_v60 = vld [vmem:[%s2262_s28 + $0x40] sm:$0xff]  ;;  %682 = vst [vmem:[#allocation2 + $0x8] sm:$0xff] %v2066_v13 }
  0x27   : > { %577 = vmatpush.msra.mxu1 %v308_v16  ;;  %1941 = vmatpush.msra.mxu2 %v308_v16  ;;  %v344_v59 = vld [vmem:[%s3324_s3 + $0xd0] sm:$0xff]  ;;  %v293_v61 = vld [vmem:[%s2262_s28 + $0xb8] sm:$0xff]  ;;  %v295_v5 = vld [vmem:[%s2262_s28 + $0xc8] sm:$0xff]  ;;  %684 = vst [vmem:[#allocation2 + $0x18] sm:$0xff] %v2066_v13 }
  0x28   : > { %470 = vmatpush.msra.mxu0 %v350_v17  ;;  %1922 = vmatpush.msra.mxu3 %v350_v17  ;;  %v328_v62 = vld [vmem:[%s3324_s3 + $0x50] sm:$0xff]  ;;  %v345_v63 = vld [vmem:[%s3324_s3 + $0xd8] sm:$0xff]  ;;  %v347_v7 = vld [vmem:[%s3324_s3 + $0xe8] sm:$0xff]  ;;  %685 = vst [vmem:[#allocation2 + $0x20] sm:$0xff] %v2066_v13 }
  0x29   : > { %578 = vmatpush.msra.mxu1 %v307_v18  ;;  %1943 = vmatpush.msra.mxu2 %v307_v18  ;;  %v280_v4 = vld [vmem:[%s2262_s28 + $0x50] sm:$0xff]  ;;  %683 = vst [vmem:[#allocation2 + $0x10] sm:$0x3] %v2066_v13  ;;  %v283_v17 = vld [vmem:[%s2262_s28 + $0x68] sm:$0xff] }
  0x2a   : > { %1875 = vmatmul.msk.f32.vlgmr.msra.gmra.mxu0 %vm358_vm0, %v318_v19  ;;  %1892 = vmatmul.msk.f32.vlgmr.msra.gmra.mxu3 %vm358_vm0, %v335_v20  ;;  %v296_v9 = vld [vmem:[%s2262_s28 + $0xd0] sm:$0xff]  ;;  %686 = vst [vmem:[#allocation2 + $0x28] sm:$0x3] %v2066_v13  ;;  %v333_v19 = vld [vmem:[%s3324_s3 + $0x78] sm:$0xff] }
  0x2b   : > { %1924 = vmatpush.msrb.mxu3 %v2155_v0  ;;  %579 = vmatpush.msra.mxu1 %v306_v21  ;;  %v279_v0 = vld [vmem:[%s2262_s28 + $0x48] sm:$0xff]  ;;  %v348_v11 = vld [vmem:[%s3324_s3 + $0xf0] sm:$0xff]  ;;  %687 = vst [vmem:[#allocation2 + $0x30] sm:$0xff] %v2066_v13 }
  0x2c   : > { %1945 = vmatpush.msra.mxu2 %v306_v21  ;;  %v332_v15 = vld [vmem:[%s3324_s3 + $0x70] sm:$0xff]  ;;  %688 = vst [vmem:[#allocation2 + $0x38] sm:$0xff] %v2066_v13 }
  0x2d   : > { %580 = vmatpush.msra.mxu1 %v305_v22  ;;  %1926 = vmatpush.msrb.mxu3 %v2160_v1  ;;  %v294_v1 = vld [vmem:[%s2262_s28 + $0xc0] sm:$0xff]  ;;  %689 = vst [vmem:[#allocation2 + $0x40] sm:$0x3] %v2066_v13  ;;  %v300_v20 = vld [vmem:[%s2262_s28 + $0xf0] sm:$0xff] }
  0x2e   : > { %1947 = vmatpush.msra.mxu2 %v305_v22  ;;  %690 = vst [vmem:[#allocation2 + $0x48] sm:$0xff] %v2066_v13 }
  0x2f   : > { %581 = vmatpush.msra.mxu1 %v304_v23  ;;  %1928 = vmatpush.msrb.mxu3 %v2168_v2  ;;  %v329_v2 = vld [vmem:[%s3324_s3 + $0x58] sm:$0xff]  ;;  %691 = vst [vmem:[#allocation2 + $0x50] sm:$0xff] %v2066_v13 }
  0x30   : > { %1949 = vmatpush.msra.mxu2 %v304_v23  ;;  %692 = vst [vmem:[#allocation2 + $0x58] sm:$0x3] %v2066_v13 }
  0x31   : > { %582 = vmatpush.msra.mxu1 %v303_v24  ;;  %1930 = vmatpush.msrb.mxu3 %v2186_v3  ;;  %v346_v3 = vld [vmem:[%s3324_s3 + $0xe0] sm:$0xff]  ;;  %693 = vst [vmem:[#allocation2 + $0x60] sm:$0xff] %v2066_v13 }
  0x32   : > { %1951 = vmatpush.msra.mxu2 %v303_v24  ;;  %1876 = vmatmul.msk.f32.gmra.mxu0 %vm358_vm0, %v319_v25  ;;  %694 = vst [vmem:[#allocation2 + $0x68] sm:$0xff] %v2066_v13  ;;  %v301_v25 = vld [vmem:[%s2262_s28 + $0xf8] sm:$0xff] }
  0x33   : > { %1893 = vmatmul.msk.f32.gmra.mxu3 %vm358_vm0, %v336_v26  ;;  %583 = vmatpush.msra.mxu1 %v302_v27  ;;  %695 = vst [vmem:[#allocation2 + $0x70] sm:$0x3] %v2066_v13 }
  0x34   : > { %1953 = vmatpush.msra.mxu2 %v302_v27  ;;  %584 = vmatmul.f32.vlgmr.msra.gmra.mxu1 %v270_v28  ;;  %696 = vst [vmem:[#allocation2 + $0x78] sm:$0xff] %v2066_v13 }
  0x35   : > { %629 = vmatmul.f32.vlgmr.msra.gmra.mxu2 %v285_v29  ;;  %1932 = vmatpush.msrb.mxu3 %v2193_v6  ;;  %v330_v6 = vld [vmem:[%s3324_s3 + $0x60] sm:$0xff]  ;;  %697 = vst [vmem:[#allocation2 + $0x80] sm:$0xff] %v2066_v13 }
  0x36   : > { %698 = vst [vmem:[#allocation2 + $0x88] sm:$0x3] %v2066_v13 }
  0x37   : > { %1934 = vmatpush.msrb.mxu3 %v2201_v8  ;;  %v281_v8 = vld [vmem:[%s2262_s28 + $0x58] sm:$0xff]  ;;  %699 = vst [vmem:[#allocation2 + $0x90] sm:$0xff] %v2066_v13 }
  0x38   : > { %700 = vst [vmem:[#allocation2 + $0x98] sm:$0xff] %v2066_v13 }
  0x39   : > { %1936 = vmatpush.msrb.mxu3 %v2209_v10  ;;  %v331_v10 = vld [vmem:[%s3324_s3 + $0x68] sm:$0xff]  ;;  %701 = vst [vmem:[#allocation2 + $0xa0] sm:$0x3] %v2066_v13 }
  0x3a   : > { %1877 = vmatmul.msk.f32.gmra.mxu0 %vm358_vm0, %v320_v30  ;;  %702 = vst [vmem:[#allocation2 + $0xa8] sm:$0xff] %v2066_v13 }
  0x3b   : > { %1894 = vmatmul.msk.f32.gmra.mxu3 %vm358_vm0, %v337_v31  ;;  %703 = vst [vmem:[#allocation2 + $0xb0] sm:$0xff] %v2066_v13 }
  0x3c   : > { %587 = vmatmul.f32.gmra.mxu1 %v271_v32  ;;  %1938 = vmatpush.msrb.mxu3 %v2217_v12  ;;  %v282_v12 = vld [vmem:[%s2262_s28 + $0x60] sm:$0xff]  ;;  %704 = vst [vmem:[#allocation2 + $0xb8] sm:$0x3] %v2066_v13 }
  0x3d   : > { %632 = vmatmul.f32.gmra.mxu2 %v286_v33  ;;  %705 = vst [vmem:[#allocation2 + $0xc0] sm:$0xff] %v2066_v13 }
  0x3e   : > { %1940 = vmatpush.msrb.mxu3 %v2225_v14  ;;  %v297_v14 = vld [vmem:[%s2262_s28 + $0xd8] sm:$0xff]  ;;  %706 = vst [vmem:[#allocation2 + $0xc8] sm:$0xff] %v2066_v13 }
  0x3f   : > { %707 = vst [vmem:[#allocation2 + $0xd0] sm:$0x3] %v2066_v13 }
  0x40   : > { %1942 = vmatpush.msrb.mxu3 %v308_v16  ;;  %v349_v16 = vld [vmem:[%s3324_s3 + $0xf8] sm:$0xff]  ;;  %708 = vst [vmem:[#allocation2 + $0xd8] sm:$0xff] %v2066_v13 }
  0x41   : > { %709 = vst [vmem:[#allocation2 + $0xe0] sm:$0xff] %v2066_v13 }
  0x42   : > { %1878 = vmatmul.msk.f32.gmra.mxu0 %vm358_vm0, %v321_v34  ;;  %1944 = vmatpush.msrb.mxu3 %v307_v18  ;;  %v298_v18 = vld [vmem:[%s2262_s28 + $0xe0] sm:$0xff]  ;;  %710 = vst [vmem:[#allocation2 + $0xe8] sm:$0x3] %v2066_v13 }
  0x43   : > { %1895 = vmatmul.msk.f32.gmra.mxu3 %vm358_vm0, %v338_v35  ;;  %711 = vst [vmem:[#allocation2 + $0xf0] sm:$0xff] %v2066_v13  ;;  %v2483_v34 = vld [vmem:[%s3325_s4] sm:$0xff] }
  0x44   : > { %590 = vmatmul.f32.gmra.mxu1 %v272_v36  ;;  %1946 = vmatpush.msrb.mxu3 %v306_v21  ;;  %v284_v21 = vld [vmem:[%s2262_s28 + $0x70] sm:$0xff]  ;;  %712 = vst [vmem:[#allocation2 + $0xf8] sm:$0xff] %v2066_v13  ;;  %v2487_v35 = vperm.slane %v2483_v34, 0  ;;  %v867_v36 = vld [vmem:[#allocation2 + $0x1] sm:$0xff] }
  0x45   : > { %635 = vmatmul.f32.gmra.mxu2 %v287_v37  ;;  %713 = vst [vmem:[#allocation2 + $0x100] sm:$0x3] %v2066_v13 }
  0x46   : > { %1948 = vmatpush.msrb.mxu3 %v305_v22  ;;  %v299_v22 = vld [vmem:[%s2262_s28 + $0xe8] sm:$0xff]  ;;  %714 = vst [vmem:[#allocation2 + $0x108] sm:$0xff] %v2066_v13 }
  0x47   : > { %715 = vst [vmem:[#allocation2 + $0x110] sm:$0xff] %v2066_v13 }
  0x48   : > { %1950 = vmatpush.msrb.mxu3 %v304_v23  ;;  %716 = vst [vmem:[#allocation2 + $0x118] sm:$0x3] %v2066_v13 }
  0x49   : > { %717 = vst [vmem:[#allocation2 + $0x120] sm:$0xff] %v2066_v13 }
  0x4a   : > { %1879 = vmatmul.msk.f32.gmra.mxu0 %vm358_vm0, %v322_v38  ;;  %1952 = vmatpush.msrb.mxu3 %v303_v24  ;;  %v334_v24 = vld [vmem:[%s3324_s3 + $0x80] sm:$0xff]  ;;  %718 = vst [vmem:[#allocation2 + $0x128] sm:$0xff] %v2066_v13  ;;  %v2494_v38 = vperm.slane %v2483_v34, 1 }
  0x4b   : > { %1896 = vmatmul.msk.f32.gmra.mxu3 %vm358_vm0, %v339_v39  ;;  %719 = vst [vmem:[#allocation2 + $0x130] sm:$0x3] %v2066_v13 }
  0x4c   : > { %593 = vmatmul.f32.gmra.mxu1 %v273_v40  ;;  %1954 = vmatpush.msrb.mxu3 %v302_v27  ;;  %720 = vst [vmem:[#allocation2 + $0x138] sm:$0xff] %v2066_v13 }
  0x4d   : > { %638 = vmatmul.f32.gmra.mxu2 %v288_v41  ;;  %721 = vst [vmem:[#allocation2 + $0x140] sm:$0xff] %v2066_v13  ;;  %v803_v41 = vmul.f32 0.0, %v2487_v35 }
  0x4e   : > { %722 = vst [vmem:[#allocation2 + $0x148] sm:$0x3] %v2066_v13 }
  0x4f   : > { %723 = vst [vmem:[#allocation2 + $0x150] sm:$0xff] %v2066_v13 }
  0x50   : > { %724 = vst [vmem:[#allocation2 + $0x158] sm:$0xff] %v2066_v13 }
  0x51   : > { %725 = vst [vmem:[#allocation2 + $0x160] sm:$0x3] %v2066_v13 }
  0x52   : > { %1880 = vmatmul.msk.f32.gmra.mxu0 %vm358_vm0, %v323_v42  ;;  %726 = vst [vmem:[#allocation2 + $0x168] sm:$0xff] %v2066_v13  ;;  %v900_v42 = vmul.f32 %v2494_v38, %v867_v36 }
  0x53   : > { %1897 = vmatmul.msk.f32.gmra.mxu3 %vm358_vm0, %v340_v43  ;;  %727 = vst [vmem:[#allocation2 + $0x170] sm:$0xff] %v2066_v13  ;;  %v2503_v43 = vperm.slane %v2483_v34, 2 }
  0x54   : > { %596 = vmatmul.f32.gmra.mxu1 %v274_v44  ;;  %728 = vst [vmem:[#allocation2 + $0x178] sm:$0x3] %v2066_v13 }
  0x55   : > { %641 = vmatmul.f32.gmra.mxu2 %v289_v45  ;;  %v964_v45 = vld [vmem:[#allocation2 + $0x2] sm:$0xff]  ;;  %729 = vst [vmem:[#allocation2 + $0x180] sm:$0xff] %v2066_v13 }
  0x56   : > { %730 = vst [vmem:[#allocation2 + $0x188] sm:$0xff] %v2066_v13 }
  0x57   : > { %731 = vst [vmem:[#allocation2 + $0x190] sm:$0x3] %v2066_v13 }
  0x58   : > { %732 = vst [vmem:[#allocation2 + $0x198] sm:$0xff] %v2066_v13 }
  0x59   : > { %733 = vst [vmem:[#allocation2 + $0x1a0] sm:$0xff] %v2066_v13 }
  0x5a   : > { %1881 = vmatmul.msk.f32.gmra.mxu0 %vm358_vm0, %v324_v46  ;;  %v868_v46 = vld [vmem:[#allocation2 + $0x9] sm:$0xff]  ;;  %734 = vst [vmem:[#allocation2 + $0x1a8] sm:$0x3] %v2066_v13 }
  0x5b   : > { %1898 = vmatmul.msk.f32.gmra.mxu3 %vm358_vm0, %v341_v47 }
  0x5c   : > { %599 = vmatmul.f32.gmra.mxu1 %v275_v48  ;;  %v932_v48 = vadd.f32 %v900_v42, %v803_v41 }
  0x5d   : > { %644 = vmatmul.f32.gmra.mxu2 %v290_v49  ;;  %v997_v49 = vmul.f32 %v2503_v43, %v964_v45 }
  0x62   : > { %1882 = vmatmul.msk.f32.gmra.mxu0 %vm358_vm0, %v325_v50  ;;  %v2511_v50 = vperm.slane %v2483_v34, 3 }
  0x63   : > { %1899 = vmatmul.msk.f32.gmra.mxu3 %vm358_vm0, %v342_v51 }
  0x64   : > { %602 = vmatmul.f32.gmra.mxu1 %v276_v52 }
  0x65   : > { %647 = vmatmul.f32.gmra.mxu2 %v291_v53  ;;  %v901_v53 = vmul.f32 %v2494_v38, %v868_v46 }
  0x6a   : > { %1883 = vmatmul.msk.f32.gmra.mxu0 %vm358_vm0, %v326_v54 }
  0x6b   : > { %1900 = vmatmul.msk.f32.gmra.mxu3 %vm358_vm0, %v343_v55  ;;  %v965_v55 = vld [vmem:[#allocation2 + $0xa] sm:$0xff] }
  0x6c   : > { %605 = vmatmul.f32.gmra.mxu1 %v277_v56 }
  0x6d   : > { %650 = vmatmul.f32.gmra.mxu2 %v292_v57 }
  0x72   : > { %1884 = vmatmul.msk.f32.gmra.mxu0 %vm358_vm0, %v327_v58  ;;  %v1029_v58 = vadd.f32 %v997_v49, %v932_v48  ;;  %v2571_v48 = vld [vmem:[%s3326_s5] ss:$0 sm:$0xff] }
  0x73   : > { %1901 = vmatmul.msk.f32.gmra.mxu3 %vm358_vm0, %v344_v59 }
  0x74   : > { %608 = vmatmul.f32.gmra.mxu1 %v278_v60 }
  0x75   : > { %653 = vmatmul.f32.gmra.mxu2 %v293_v61 }
  0x7a   : > { %1885 = vmatmul.msk.f32.gmra.mxu0 %vm358_vm0, %v328_v62  ;;  %v933_v62 = vadd.f32 %v901_v53, %v803_v41 }
  0x7b   : > { %1902 = vmatmul.msk.f32.gmra.mxu3 %vm358_vm0, %v345_v63  ;;  %v998_v63 = vmul.f32 %v2503_v43, %v965_v55 }
  0x7c   : > { %611 = vmatmul.f32.gmra.mxu1 %v279_v0 }
  0x7d   : > { %656 = vmatmul.f32.gmra.mxu2 %v294_v1  ;;  %v2530_v1 = vperm.slane %v2483_v34, 4 }
  0x7f   : > { %3336 = vst [vmem:[#allocation8_spill] sm:$0xff] %v2530_v1 }
  0x82   : > { %1886 = vmatmul.msk.f32.gmra.mxu0 %vm358_vm0, %v329_v2 }
  0x83   : > { %1903 = vmatmul.msk.f32.gmra.mxu3 %vm358_vm0, %v346_v3  ;;  %v2535_v3 = vperm.slane %v2483_v34, 5 }
  0x84   : > { %614 = vmatmul.f32.gmra.mxu1 %v280_v4  ;;  %v1030_v4 = vadd.f32 %v998_v63, %v933_v62 }
  0x85   : > { %659 = vmatmul.f32.gmra.mxu2 %v295_v5  ;;  %v2538_v5 = vperm.slane %v2483_v34, 6 }
  0x8a   : > { %1887 = vmatmul.msk.f32.gmra.mxu0 %vm358_vm0, %v330_v6 }
  0x8b   : > { %1904 = vmatmul.msk.f32.gmra.mxu3 %vm358_vm0, %v347_v7 }
  0x8c   : > { %617 = vmatmul.f32.gmra.mxu1 %v281_v8 }
  0x8d   : > { %662 = vmatmul.f32.gmra.mxu2 %v296_v9 }
  0x92   : > { %1888 = vmatmul.msk.f32.gmra.mxu0 %vm358_vm0, %v331_v10 }
  0x93   : > { %1905 = vmatmul.msk.f32.gmra.mxu3 %vm358_vm0, %v348_v11 }
  0x94   : > { %620 = vmatmul.f32.gmra.mxu1 %v282_v12 }
  0x95   : > { %665 = vmatmul.f32.gmra.mxu2 %v297_v14 }
  0x9a   : > { %1889 = vmatmul.msk.f32.gmra.mxu0 %vm358_vm0, %v332_v15 }
  0x9b   : > { %1906 = vmatmul.msk.f32.gmra.mxu3 %vm358_vm0, %v349_v16 }
  0x9c   : > { %623 = vmatmul.f32.gmra.mxu1 %v283_v17 }
  0x9d   : > { %668 = vmatmul.f32.gmra.mxu2 %v298_v18 }
  0xa2   : > { %1890 = vmatmul.msk.f32.gmra.mxu0 %vm358_vm0, %v333_v19 }
  0xa3   : > { %674 = vmatmul.f32.vlgmr.msrb.gmra.mxu3 %v300_v20  ;;  %v2549_v20 = vperm.slane %v2483_v34, 7 }
  0xa4   : > { %626 = vmatmul.f32.gmra.mxu1 %v284_v21 }
  0xa5   : > { %671 = vmatmul.f32.gmra.mxu2 %v299_v22  ;;  %3337 = vst [vmem:[#allocation9_spill] sm:$0xff] %v2549_v20 }
  0xa7   : > { %v472_v23 = vpop.f32.mrf.mxu0 }
  0xaa   : > { %1891 = vmatmul.msk.f32.gmra.mxu0 %vm358_vm0, %v334_v24 }
  0xab   : > { %677 = vmatmul.f32.gmra.mxu3 %v301_v25 }
  0xad   : > { %v2457_v26 = vpop.f32.mrf.mxu3 }
  0xaf   : > { %v475_v27 = vpop.f32.mrf.mxu0 }
  0xb1   : > { %v585_v28 = vpop.f32.mrf.mxu1 }
  0xb2   : > { %v2464_v29 = vadd.f32 %v585_v28, %v472_v23 }
  0xb4   : > { %736 = vst [vmem:[#allocation2 + $0x19] sm:$0xff] %v2464_v29  ;;  %v1191_v7 = vmul.f32 %v2530_v1, %v2464_v29  ;;  %v902_v36 = vmul.f32 %v2494_v38, %v2464_v29 }
  0xb6   : > { %v2471_v30 = vpop.f32.mrf.mxu3 }
  0xb7   : > { %v478_v31 = vpop.f32.mrf.mxu0 }
  0xb8   : > { %v2475_v32 = vpop.f32.mrf.mxu2 }
  0xb9   : > { %3334 = vst [vmem:[#allocation6_spill] sm:$0xff] %v2475_v32  ;;  %v588_v33 = vpop.f32.mrf.mxu1 }
  0xba   : > { %v589_v47 = vadd.f32 %v588_v33, %v475_v27  ;;  %v2558_v33 = vld [vmem:[%s3325_s4 + $0x8] ss:$0 sm:$0xff] }
  0xbb   : > { %v772_v52 = vld [vmem:[#allocation2 + $0x18] sm:$0xff] }
  0xbc   : > { %737 = vst [vmem:[#allocation2 + $0x21] sm:$0xff] %v589_v47  ;;  %v1094_v59 = vmul.f32 %v2511_v50, %v772_v52  ;;  %v1192_v18 = vmul.f32 %v2530_v1, %v589_v47  ;;  %v805_v34 = vmul.f32 %v2487_v35, %v772_v52 }
  0xbe   : > { %v2491_v37 = vpop.f32.mrf.mxu3  ;;  %v1126_v2 = vadd.f32 %v1094_v59, %v1029_v58 }
  0xbf   : > { %v481_v39 = vpop.f32.mrf.mxu0 }
  0xc0   : > { %v2498_v40 = vpop.f32.mrf.mxu2  ;;  %v1223_v14 = vadd.f32 %v1191_v7, %v1126_v2  ;;  %v934_v2 = vadd.f32 %v902_v36, %v805_v34 }
  0xc1   : > { %3335 = vst [vmem:[#allocation7_spill] sm:$0xff] %v2498_v40  ;;  %v591_v44 = vpop.f32.mrf.mxu1 }
  0xc2   : > { %v2514_v51 = vadd.f32 %v591_v44, %v478_v31 }
  0xc3   : > { %v773_v8 = vld [vmem:[#allocation2 + $0x20] sm:$0xff] }
  0xc4   : > { %738 = vst [vmem:[#allocation2 + $0x31] sm:$0xff] %v2514_v51  ;;  %v966_v9 = vld [vmem:[#allocation2 + $0x1a] sm:$0xff]  ;;  %v1095_v11 = vmul.f32 %v2511_v50, %v773_v8  ;;  %v967_v21 = vld [vmem:[#allocation2 + $0x22] sm:$0xff]  ;;  %v806_v24 = vmul.f32 %v2487_v35, %v773_v8  ;;  %v1483_v31 = vmul.f32 %v2549_v20, %v2514_v51 }
  0xc5   : > { %v1288_v15 = vmul.f32 %v2535_v3, %v966_v9  ;;  %v1289_v28 = vmul.f32 %v2535_v3, %v967_v21  ;;  %v999_v29 = vmul.f32 %v2503_v43, %v966_v9 }
  0xc6   : > { %v2518_v54 = vpop.f32.mrf.mxu3  ;;  %v1127_v17 = vadd.f32 %v1095_v11, %v1030_v4  ;;  %v1000_v4 = vmul.f32 %v2503_v43, %v967_v21 }
  0xc7   : > { %v484_v56 = vpop.f32.mrf.mxu0  ;;  %v1320_v22 = vadd.f32 %v1288_v15, %v1223_v14  ;;  %v1031_v11 = vadd.f32 %v999_v29, %v934_v2  ;;  %v1193_v14 = vmul.f32 %v2530_v1, %v2514_v51 }
  0xc8   : > { %v636_v57 = vpop.f32.mrf.mxu2  ;;  %v1224_v23 = vadd.f32 %v1192_v18, %v1127_v17 }
  0xc9   : > { %v2524_v60 = vadd.f32 %v636_v57, %v2457_v26  ;;  %v594_v61 = vpop.f32.mrf.mxu1 }
  0xca   : > { %v2527_v0 = vadd.f32 %v594_v61, %v481_v39  ;;  %v903_v39 = vmul.f32 %v2494_v38, %v589_v47  ;;  %v1321_v42 = vadd.f32 %v1289_v28, %v1224_v23 }
  0xcb   : > { %753 = vst [vmem:[#allocation2 + $0xe1] sm:$0xff] %v2524_v60  ;;  %v774_v12 = vld [vmem:[#allocation2 + $0x30] sm:$0xff] }
  0xcc   : > { %739 = vst [vmem:[#allocation2 + $0x39] sm:$0xff] %v2527_v0  ;;  %v1386_v19 = vmul.f32 %v2538_v5, %v774_v12  ;;  %v935_v53 = vadd.f32 %v903_v39, %v806_v24  ;;  %v1484_v61 = vmul.f32 %v2549_v20, %v2527_v0  ;;  %v1096_v7 = vmul.f32 %v2511_v50, %v774_v12 }
  0xcd   : > { %v905_v23 = vmul.f32 %v2494_v38, %v2527_v0 }
  0xce   : > { %v2540_v6 = vpop.f32.mrf.mxu3  ;;  %v1418_v25 = vadd.f32 %v1386_v19, %v1320_v22  ;;  %v1128_v21 = vadd.f32 %v1096_v7, %v1031_v11  ;;  %v2610_v22 = vmul.f32 %v2494_v38, %v2524_v60 }
  0xcf   : > { %v487_v10 = vpop.f32.mrf.mxu0 }
  0xd0   : > { %v639_v13 = vpop.f32.mrf.mxu2  ;;  %v1515_v44 = vadd.f32 %v1483_v31, %v1418_v25  ;;  %3338 = vst [vmem:[#allocation10_spill] sm:$0xff] %v2610_v22  ;;  %v2616_v25 = vmul.f32 %v2530_v1, %v2524_v60 }
  0xd1   : > { %v597_v16 = vpop.f32.mrf.mxu1  ;;  %v2578_v55 = vadd.f32 %v639_v13, %v2471_v30  ;;  %v904_v30 = vmul.f32 %v2494_v38, %v2514_v51  ;;  %v1032_v13 = vadd.f32 %v1000_v4, %v935_v53 }
  0xd2   : > { %v2580_v57 = vadd.f32 %v597_v16, %v484_v56  ;;  %v807_v16 = vmul.f32 %v2487_v35, %v774_v12  ;;  %v983_v51 = vld [vmem:[#allocation2 + $0xe2] sm:$0xff]  ;;  %3339 = vst [vmem:[#allocation11_spill] sm:$0xff] %v2616_v25  ;;  %v1194_v12 = vmul.f32 %v2530_v1, %v2527_v0  ;;  %v2631_v0 = vmul.f32 %v2549_v20, %v2524_v60 }
  0xd3   : > { %v775_v26 = vld [vmem:[#allocation2 + $0x38] sm:$0xff]  ;;  %754 = vst [vmem:[#allocation2 + $0xf1] sm:$0xff] %v2578_v55 }
  0xd4   : > { %v968_v27 = vld [vmem:[#allocation2 + $0x32] sm:$0xff]  ;;  %v1387_v45 = vmul.f32 %v2538_v5, %v775_v26  ;;  %v2575_v47 = vld [vmem:[#allocation2 + $0x3a] sm:$0xff]  ;;  %v1097_v8 = vmul.f32 %v2511_v50, %v775_v26  ;;  %740 = vst [vmem:[#allocation2 + $0x49] sm:$0xff] %v2580_v57  ;;  %v808_v15 = vmul.f32 %v2487_v35, %v775_v26  ;;  %v906_v11 = vmul.f32 %v2494_v38, %v2580_v57 }
  0xd5   : > { %v1580_v46 = vmul.f32 %v2558_v33, %v968_v27  ;;  %v1001_v34 = vmul.f32 %v2503_v43, %v968_v27  ;;  %v1290_v36 = vmul.f32 %v2535_v3, %v968_v27  ;;  %3340 = vst [vmem:[#allocation12_spill] sm:$0xff] %v2631_v0  ;;  %v1225_v27 = vadd.f32 %v1193_v14, %v1128_v21 }
  0xd6   : > { %v2564_v41 = vpop.f32.mrf.mxu3  ;;  %v1419_v59 = vadd.f32 %v1387_v45, %v1321_v42  ;;  %v1129_v24 = vadd.f32 %v1097_v8, %v1032_v13  ;;  %v937_v31 = vadd.f32 %v905_v23, %v808_v15  ;;  %v936_v45 = vadd.f32 %v904_v30, %v807_v16 }
  0xd7   : > { %v490_v49 = vpop.f32.mrf.mxu0  ;;  %v1612_v62 = vadd.f32 %v1580_v46, %v1515_v44  ;;  %v1002_v29 = vmul.f32 %v2503_v43, %v2575_v47  ;;  %v1291_v7 = vmul.f32 %v2535_v3, %v2575_v47  ;;  %v1322_v8 = vadd.f32 %v1290_v36, %v1225_v27 }
  0xd8   : > { %v642_v52 = vpop.f32.mrf.mxu2  ;;  %v1516_v56 = vadd.f32 %v1484_v61, %v1419_v59  ;;  %v2648_v59 = vmul.f32 %v2535_v3, %v983_v51  ;;  %v2651_v61 = vmul.f32 %v2558_v33, %v983_v51  ;;  %v1033_v2 = vadd.f32 %v1001_v34, %v936_v45 }
  0xd9   : > { %v600_v58 = vpop.f32.mrf.mxu1  ;;  %v2585_v63 = vadd.f32 %v642_v52, %v2491_v37  ;;  %v1581_v37 = vmul.f32 %v2558_v33, %v2575_v47  ;;  %v1648_v9 = vadd.f32 %v2571_v48, %v1612_v62  ;;  %v2655_v4 = vadd.f32 %v1002_v29, %v937_v31 }
  0xda   : > { %v2606_v19 = vadd.f32 %v600_v58, %v487_v10  ;;  %v1226_v58 = vadd.f32 %v1194_v12, %v1129_v24  ;;  %3342 = vst [vmem:[#allocation14_spill] sm:$0xff] %v2648_v59  ;;  %v790_v30 = vld [vmem:[#allocation2 + $0xf0] sm:$0xff]  ;;  %v1195_v47 = vmul.f32 %v2530_v1, %v2580_v57  ;;  %v1485_v16 = vmul.f32 %v2549_v20, %v2580_v57 }
  0xdb   : > { %755 = vst [vmem:[#allocation2 + $0xf9] sm:$0xff] %v2585_v63  ;;  %v1613_v17 = vadd.f32 %v1581_v37, %v1516_v56  ;;  %v1680_v18 = vmax.f32 %v1648_v9, 0.0  ;;  %v776_v60 = vld [vmem:[#allocation2 + $0x48] sm:$0xff]  ;;  %v920_v56 = vmul.f32 %v2494_v38, %v2578_v55  ;;  %v2664_v37 = vmul.f32 %v2530_v1, %v2578_v55 }
  0xdc   : > { %741 = vst [vmem:[#allocation2 + $0x51] sm:$0xff] %v2606_v19  ;;  %v1388_v62 = vmul.f32 %v2538_v5, %v776_v60  ;;  %v2668_v9 = vmul.f32 %v2549_v20, %v2578_v55  ;;  %v1323_v14 = vadd.f32 %v1291_v7, %v1226_v58  ;;  %v1098_v21 = vmul.f32 %v2511_v50, %v776_v60 }
  0xdd   : > { %v1649_v10 = vadd.f32 %v2571_v48, %v1613_v17  ;;  %v1712_v26 = vmin.f32 %v1680_v18, 6.0  ;;  %3343 = vst [vmem:[#allocation15_spill] sm:$0xff] %v2651_v61  ;;  %v823_v18 = vmul.f32 %v2487_v35, %v790_v30  ;;  %v921_v55 = vmul.f32 %v2494_v38, %v2585_v63 }
  0xde   : > { %v2624_v39 = vpop.f32.mrf.mxu3  ;;  %3344 = vst [vmem:[#allocation16_spill] sm:$0xff] %v2664_v37  ;;  %v1420_v15 = vadd.f32 %v1388_v62, %v1322_v8  ;;  %v2682_v23 = vmul.f32 %v2530_v1, %v2585_v63  ;;  %v907_v31 = vmul.f32 %v2494_v38, %v2606_v19  ;;  %v2693_v36 = vmul.f32 %v2511_v50, %v790_v30 }
  0xdf   : > { %v1681_v46 = vmax.f32 %v1649_v10, 0.0  ;;  %1744 = vst [vmem:[%s2634_s29] sm:$0xff] %v1712_v26  ;;  %v2637_v52 = vpop.f32.mrf.mxu0  ;;  %v809_v10 = vmul.f32 %v2487_v35, %v776_v60  ;;  %v1196_v45 = vmul.f32 %v2530_v1, %v2606_v19  ;;  %v2701_v27 = vmul.f32 %v2538_v5, %v790_v30 }
  0xe0   : > { %v645_v28 = vpop.f32.mrf.mxu2  ;;  %3345 = vst [vmem:[#allocation17_spill] sm:$0xff] %v2668_v9  ;;  %v1130_v62 = vadd.f32 %v1098_v21, %v1033_v2 }
  0xe1   : > { %v2627_v42 = vadd.f32 %v645_v28, %v2518_v54  ;;  %v603_v44 = vpop.f32.mrf.mxu1  ;;  %v2642_v54 = vmul.f32 %v2503_v43, %v983_v51  ;;  %3346 = vst [vmem:[#allocation18_spill] sm:$0xff] %v2682_v23  ;;  %v2688_v28 = vmul.f32 %v2549_v20, %v2585_v63  ;;  %v1517_v63 = vadd.f32 %v1485_v16, %v1420_v15 }
  0xe2   : > { %v2639_v53 = vadd.f32 %v603_v44, %v490_v49  ;;  %v1713_v49 = vmin.f32 %v1681_v46, 6.0  ;;  %v791_v13 = vld [vmem:[#allocation2 + $0xf8] sm:$0xff]  ;;  %3348 = vst [vmem:[#allocation20_spill] sm:$0xff] %v2693_v36  ;;  %v1486_v46 = vmul.f32 %v2549_v20, %v2606_v19  ;;  %v938_v19 = vadd.f32 %v906_v11, %v809_v10 }
  0xe3   : > { %3341 = vst [vmem:[#allocation13_spill] sm:$0xff] %v2642_v54  ;;  %v984_v17 = vld [vmem:[#allocation2 + $0xf2] sm:$0xff]  ;;  %v970_v51 = vld [vmem:[#allocation2 + $0x4a] sm:$0xff]  ;;  %v824_v26 = vmul.f32 %v2487_v35, %v791_v13  ;;  %v985_v57 = vld [vmem:[#allocation2 + $0xfa] sm:$0xff]  ;;  %v2711_v16 = vmul.f32 %v2511_v50, %v791_v13  ;;  %v1227_v10 = vadd.f32 %v1195_v47, %v1130_v62 }
  0xe4   : > { %756 = vst [vmem:[#allocation2 + $0x109] sm:$0xff] %v2627_v42  ;;  %v777_v24 = vld [vmem:[#allocation2 + $0x50] sm:$0xff]  ;;  %v1017_v44 = vmul.f32 %v2503_v43, %v984_v17  ;;  %v1582_v58 = vmul.f32 %v2558_v33, %v970_v51  ;;  %v1018_v7 = vmul.f32 %v2503_v43, %v985_v57  ;;  %v1292_v47 = vmul.f32 %v2535_v3, %v970_v51 }
  0xe5   : > { %742 = vst [vmem:[#allocation2 + $0x61] sm:$0xff] %v2639_v53  ;;  %v1389_v29 = vmul.f32 %v2538_v5, %v777_v24  ;;  %v971_v8 = vld [vmem:[#allocation2 + $0x52] sm:$0xff]  ;;  %v953_v9 = vadd.f32 %v921_v55, %v824_v26  ;;  %v1099_v2 = vmul.f32 %v2511_v50, %v777_v24  ;;  %v2723_v26 = vmul.f32 %v2538_v5, %v791_v13 }
  0xe6   : > { %1745 = vst [vmem:[%s2634_s29 + $0x8] sm:$0xff] %v1713_v49  ;;  %v2705_v60 = vpop.f32.mrf.mxu3  ;;  %v952_v49 = vadd.f32 %v920_v56, %v823_v18  ;;  %v1614_v0 = vadd.f32 %v1582_v58, %v1517_v63  ;;  %v2718_v56 = vmul.f32 %v2535_v3, %v985_v57  ;;  %v1583_v21 = vmul.f32 %v2558_v33, %v971_v8 }
  0xe7   : > { %3347 = vst [vmem:[#allocation19_spill] sm:$0xff] %v2688_v28  ;;  %v922_v28 = vmul.f32 %v2494_v38, %v2627_v42  ;;  %v496_v61 = vpop.f32.mrf.mxu0  ;;  %v1421_v30 = vadd.f32 %v1389_v29, %v1323_v14  ;;  %v810_v63 = vmul.f32 %v2487_v35, %v777_v24  ;;  %v2729_v58 = vadd.f32 %v1018_v7, %v953_v9 }
  0xe8   : > { %v648_v12 = vpop.f32.mrf.mxu2  ;;  %3349 = vst [vmem:[#allocation21_spill] sm:$0xff] %v2701_v27  ;;  %v1049_v15 = vadd.f32 %v1017_v44, %v952_v49  ;;  %v2714_v27 = vmul.f32 %v2535_v3, %v984_v17  ;;  %v1650_v11 = vadd.f32 %v2571_v48, %v1614_v0  ;;  %v2726_v44 = vmul.f32 %v2558_v33, %v984_v17 }
  0xe9   : > { %v606_v34 = vpop.f32.mrf.mxu1  ;;  %3350 = vst [vmem:[#allocation22_spill] sm:$0xff] %v2711_v16  ;;  %v1518_v18 = vadd.f32 %v1486_v46, %v1421_v30  ;;  %v1003_v46 = vmul.f32 %v2503_v43, %v970_v51  ;;  %v1131_v0 = vadd.f32 %v1099_v2, %v2655_v4  ;;  %v649_v9 = vadd.f32 %v648_v12, %v2540_v6 }
  0xea   : > { %3351 = vst [vmem:[#allocation23_spill] sm:$0xff] %v2714_v27  ;;  %v1682_v30 = vmax.f32 %v1650_v11, 0.0  ;;  %v607_v7 = vadd.f32 %v606_v34, %v2637_v52  ;;  %v2743_v51 = vmul.f32 %v2558_v33, %v985_v57  ;;  %v1004_v2 = vmul.f32 %v2503_v43, %v971_v8 }
  0xeb   : > { %3352 = vst [vmem:[#allocation24_spill] sm:$0xff] %v2718_v56  ;;  %v792_v55 = vld [vmem:[#allocation2 + $0x108] sm:$0xff]  ;;  %v1615_v49 = vadd.f32 %v1583_v21, %v1518_v18  ;;  %v1035_v11 = vadd.f32 %v1003_v46, %v938_v19  ;;  %v1228_v6 = vadd.f32 %v1196_v45, %v1131_v0  ;;  %v1293_v52 = vmul.f32 %v2535_v3, %v971_v8 }
  0xec   : > { %v778_v14 = vld [vmem:[#allocation2 + $0x60] sm:$0xff]  ;;  %3353 = vst [vmem:[#allocation25_spill] sm:$0xff] %v2723_v26  ;;  %v1114_v13 = vmul.f32 %v2511_v50, %v792_v55  ;;  %v1714_v24 = vmin.f32 %v1682_v30, 6.0  ;;  %v825_v18 = vmul.f32 %v2487_v35, %v792_v55  ;;  %v1324_v12 = vadd.f32 %v1292_v47, %v1227_v10 }
  0xed   : > { %3354 = vst [vmem:[#allocation26_spill] sm:$0xff] %v2726_v44  ;;  %v1100_v17 = vmul.f32 %v2511_v50, %v778_v14  ;;  %v1651_v62 = vadd.f32 %v2571_v48, %v1615_v49  ;;  %v939_v44 = vadd.f32 %v907_v31, %v810_v63  ;;  %v1390_v21 = vmul.f32 %v2538_v5, %v778_v14 }
  0xee   : > { %3355 = vst [vmem:[#allocation27_spill] sm:$0xff] %v2743_v51  ;;  %v2747_v49 = vpop.f32.mrf.mxu3  ;;  %v811_v57 = vmul.f32 %v2487_v35, %v778_v14  ;;  %v954_v19 = vadd.f32 %v922_v28, %v825_v18  ;;  %v1211_v46 = vmul.f32 %v2530_v1, %v2627_v42  ;;  %v2757_v10 = vmul.f32 %v2538_v5, %v792_v55 }
  0xef   : > { %v1683_v26 = vmax.f32 %v1651_v62, 0.0  ;;  %1746 = vst [vmem:[%s2634_s29 + $0x10] sm:$0xff] %v1714_v24  ;;  %v499_v31 = vpop.f32.mrf.mxu0  ;;  %v2751_v30 = vadd.f32 %v1004_v2, %v939_v44  ;;  %v1422_v45 = vadd.f32 %v1390_v21, %v1324_v12  ;;  %v1325_v28 = vadd.f32 %v1293_v52, %v1228_v6 }
  0xf0   : > { %v651_v29 = vpop.f32.mrf.mxu2  ;;  %757 = vst [vmem:[#allocation2 + $0x111] sm:$0xff] %v649_v9  ;;  %v1487_v44 = vmul.f32 %v2549_v20, %v2639_v53  ;;  %v1212_v62 = vmul.f32 %v2530_v1, %v649_v9  ;;  %v2777_v24 = vmul.f32 %v2549_v20, %v649_v9  ;;  %v1198_v21 = vmul.f32 %v2530_v1, %v607_v7 }
  0xf1   : > { %v609_v56 = vpop.f32.mrf.mxu1  ;;  %v652_v4 = vadd.f32 %v651_v29, %v2564_v41  ;;  %v1715_v63 = vmin.f32 %v1683_v26, 6.0  ;;  %v1146_v41 = vadd.f32 %v1114_v13, %v1049_v15  ;;  %v1132_v29 = vadd.f32 %v1100_v17, %v1035_v11  ;;  %743 = vst [vmem:[#allocation2 + $0x69] sm:$0xff] %v607_v7 }
  0xf2   : > { %v610_v34 = vadd.f32 %v609_v56, %v496_v61  ;;  %3356 = vst [vmem:[#allocation28_spill] sm:$0xff] %v2757_v10  ;;  %v908_v61 = vmul.f32 %v2494_v38, %v2639_v53  ;;  %v1197_v15 = vmul.f32 %v2530_v1, %v2639_v53  ;;  %v2766_v26 = vmul.f32 %v2549_v20, %v2627_v42 }
  0xf3   : > { %758 = vst [vmem:[#allocation2 + $0x121] sm:$0xff] %v652_v4  ;;  %v1243_v0 = vadd.f32 %v1211_v46, %v1146_v41  ;;  %v923_v17 = vmul.f32 %v2494_v38, %v649_v9  ;;  %v909_v42 = vmul.f32 %v2494_v38, %v607_v7  ;;  %v1488_v2 = vmul.f32 %v2549_v20, %v607_v7 }
  0xf4   : > { %1747 = vst [vmem:[%s2634_s29 + $0x18] sm:$0xff] %v1715_v63  ;;  %v2770_v47 = vadd.f32 %v908_v61, %v811_v57  ;;  %v2772_v13 = vadd.f32 %v1197_v15, %v1132_v29  ;;  %v2783_v11 = vmul.f32 %v2494_v38, %v652_v4  ;;  %v2786_v6 = vmul.f32 %v2530_v1, %v652_v4 }
  0xf5   : > { %3357 = vst [vmem:[#allocation29_spill] sm:$0xff] %v2766_v26  ;;  %v2794_v63 = vmul.f32 %v2494_v38, %v610_v34  ;;  %v2798_v57 = vmul.f32 %v2530_v1, %v610_v34  ;;  %v2801_v29 = vmul.f32 %v2549_v20, %v610_v34 }
  0xf6   : > { %744 = vst [vmem:[#allocation2 + $0x79] sm:$0xff] %v610_v34  ;;  %v2803_v46 = vpop.f32.mrf.mxu3 }
  0xf7   : > { %3358 = vst [vmem:[#allocation30_spill] sm:$0xff] %v2777_v24  ;;  %v793_v53 = vld [vmem:[#allocation2 + $0x110] sm:$0xff] }
  0xf8   : > { %v654_v8 = vpop.f32.mrf.mxu2  ;;  %v986_v18 = vld [vmem:[#allocation2 + $0x10a] sm:$0xff]  ;;  %v826_v52 = vmul.f32 %v2487_v35, %v793_v53  ;;  %v987_v12 = vld [vmem:[#allocation2 + $0x112] sm:$0xff]  ;;  %v1115_v9 = vmul.f32 %v2511_v50, %v793_v53  ;;  %v972_v24 = vld [vmem:[#allocation2 + $0x62] sm:$0xff]  ;;  %v2836_v25 = vmul.f32 %v2538_v5, %v793_v53 }
  0xf9   : > { %v655_v56 = vadd.f32 %v654_v8, %v2624_v39  ;;  %v612_v14 = vpop.f32.mrf.mxu1  ;;  %v1519_v39 = vadd.f32 %v1487_v44, %v1422_v45  ;;  %v1019_v41 = vmul.f32 %v2503_v43, %v986_v18  ;;  %v779_v7 = vld [vmem:[#allocation2 + $0x68] sm:$0xff]  ;;  %v2809_v8 = vpop.f32.mrf.mxu0  ;;  %v1020_v51 = vmul.f32 %v2503_v43, %v987_v12 }
  0xfa   : > { %v613_v55 = vadd.f32 %v612_v14, %v499_v31  ;;  %v2791_v31 = vmul.f32 %v2549_v20, %v652_v4  ;;  %v1308_v4 = vmul.f32 %v2535_v3, %v986_v18  ;;  %v955_v44 = vadd.f32 %v923_v17, %v826_v52  ;;  %v973_v37 = vld [vmem:[#allocation2 + $0x6a] sm:$0xff]  ;;  %3359 = vst [vmem:[#allocation31_spill] sm:$0xff] %v2836_v25  ;;  %v794_v22 = vld [vmem:[#allocation2 + $0x120] sm:$0xff] }
  0xfb   : > { %759 = vst [vmem:[#allocation2 + $0x129] sm:$0xff] %v655_v56  ;;  %v2806_v45 = vmul.f32 %v2494_v38, %v655_v56  ;;  %v2812_v61 = vmul.f32 %v2530_v1, %v655_v56  ;;  %v2815_v15 = vmul.f32 %v2549_v20, %v655_v56  ;;  %v1147_v56 = vadd.f32 %v1115_v9, %v2729_v58 }
  0xfc   : > { %745 = vst [vmem:[#allocation2 + $0x81] sm:$0xff] %v613_v55  ;;  %v2818_v14 = vmul.f32 %v2494_v38, %v613_v55  ;;  %v2824_v26 = vmul.f32 %v2530_v1, %v613_v55  ;;  %v2827_v10 = vmul.f32 %v2549_v20, %v613_v55  ;;  %v1309_v59 = vmul.f32 %v2535_v3, %v987_v12 }
  0xfd   : > { %v812_v23 = vmul.f32 %v2487_v35, %v779_v7  ;;  %v1101_v17 = vmul.f32 %v2511_v50, %v779_v7  ;;  %v1051_v52 = vadd.f32 %v1019_v41, %v954_v19  ;;  %v2839_v16 = vmul.f32 %v2558_v33, %v986_v18  ;;  %v780_v25 = vld [vmem:[#allocation2 + $0x78] sm:$0xff] }
  0xfe   : > { %v1391_v55 = vmul.f32 %v2538_v5, %v779_v7  ;;  %v1340_v36 = vadd.f32 %v1308_v4, %v1243_v0  ;;  %v2843_v54 = vmul.f32 %v2558_v33, %v987_v12  ;;  %v1005_v58 = vmul.f32 %v2503_v43, %v972_v24 }
  0xff   : > { %3360 = vst [vmem:[#allocation32_spill] sm:$0xff] %v2839_v16  ;;  %v1584_v9 = vmul.f32 %v2558_v33, %v972_v24  ;;  %v1052_v40 = vadd.f32 %v1020_v51, %v955_v44  ;;  %v1006_v19 = vmul.f32 %v2503_v43, %v973_v37  ;;  %v1133_v53 = vadd.f32 %v1101_v17, %v2751_v30 }
 0x100   : > { %v2820_v34 = vpop.f32.mrf.mxu2  ;;  %3361 = vst [vmem:[#allocation33_spill] sm:$0xff] %v2843_v54  ;;  %v1423_v41 = vadd.f32 %v1391_v55, %v1325_v28  ;;  %v1244_v18 = vadd.f32 %v1212_v62, %v1147_v56  ;;  %v941_v16 = vadd.f32 %v909_v42, %v812_v23  ;;  %v1294_v7 = vmul.f32 %v2535_v3, %v972_v24 }
 0x101   : > { %v2829_v27 = vpop.f32.mrf.mxu1  ;;  %v1616_v0 = vadd.f32 %v1584_v9, %v1519_v39  ;;  %v1585_v12 = vmul.f32 %v2558_v33, %v973_v37  ;;  %v1116_v54 = vmul.f32 %v2511_v50, %v794_v22  ;;  %v1406_v32 = vmul.f32 %v2538_v5, %v794_v22 }
 0x102   : > { %v1520_v4 = vadd.f32 %v1488_v2, %v1423_v41  ;;  %v795_v20 = vld [vmem:[#allocation2 + $0x128] sm:$0xff]  ;;  %v1037_v51 = vadd.f32 %v1005_v58, %v2770_v47  ;;  %v827_v30 = vmul.f32 %v2487_v35, %v794_v22  ;;  %v1102_v28 = vmul.f32 %v2511_v50, %v780_v25  ;;  %v2865_v58 = vpop.f32.mrf.mxu3  ;;  %v2867_v22 = vpop.f32.mrf.mxu0 }
 0x103   : > { %v1652_v44 = vadd.f32 %v2571_v48, %v1616_v0  ;;  %v1230_v62 = vadd.f32 %v1198_v21, %v1133_v53  ;;  %v1295_v39 = vmul.f32 %v2535_v3, %v973_v37  ;;  %v1392_v42 = vmul.f32 %v2538_v5, %v780_v25  ;;  %3362 = vst [vmem:[#allocation34_spill] sm:$0xff] %v2865_v58  ;;  %v988_v41 = vld [vmem:[#allocation2 + $0x122] sm:$0xff]  ;;  %v989_v1 = vld [vmem:[#allocation2 + $0x12a] sm:$0xff] }
 0x104   : > { %v1617_v24 = vadd.f32 %v1585_v12, %v1520_v4  ;;  %v1341_v56 = vadd.f32 %v1309_v59, %v1244_v18  ;;  %v813_v47 = vmul.f32 %v2487_v35, %v780_v25  ;;  %v828_v55 = vmul.f32 %v2487_v35, %v795_v20 }
 0x105   : > { %v1684_v17 = vmax.f32 %v1652_v44, 0.0  ;;  %v1326_v21 = vadd.f32 %v1294_v7, %v2772_v13  ;;  %v1148_v9 = vadd.f32 %v1116_v54, %v1051_v52  ;;  %v1438_v53 = vadd.f32 %v1406_v32, %v1340_v36 }
 0x106   : > { %v1653_v37 = vadd.f32 %v2571_v48, %v1617_v24  ;;  %v1038_v0 = vadd.f32 %v1006_v19, %v941_v16  ;;  %v956_v59 = vadd.f32 %v2783_v11, %v827_v30  ;;  %v1134_v18 = vadd.f32 %v1102_v28, %v1037_v51  ;;  %v781_v16 = vld [vmem:[#allocation2 + $0x80] sm:$0xff] }
 0x107   : > { %v1716_v4 = vmin.f32 %v1684_v17, 6.0  ;;  %v1327_v25 = vadd.f32 %v1295_v39, %v1230_v62  ;;  %v1424_v44 = vadd.f32 %v1392_v42, %v1326_v21  ;;  %v1117_v58 = vmul.f32 %v2511_v50, %v795_v20  ;;  %v974_v39 = vld [vmem:[#allocation2 + $0x7a] sm:$0xff] }
 0x108   : > { %v2857_v23 = vpop.f32.mrf.mxu2  ;;  %v1685_v12 = vmax.f32 %v1653_v37, 0.0  ;;  %v2875_v13 = vadd.f32 %v2794_v63, %v813_v47  ;;  %v957_v54 = vadd.f32 %v2806_v45, %v828_v55  ;;  %v1021_v32 = vmul.f32 %v2503_v43, %v988_v41 }
 0x109   : > { %v2861_v2 = vpop.f32.mrf.mxu1  ;;  %1748 = vst [vmem:[%s2634_s29 + $0x20] sm:$0xff] %v1716_v4  ;;  %v1407_v36 = vmul.f32 %v2538_v5, %v795_v20  ;;  %v1245_v52 = vadd.f32 %v2786_v6, %v1148_v9  ;;  %v1535_v19 = vadd.f32 %v2791_v31, %v1438_v53  ;;  %v1600_v7 = vmul.f32 %v2558_v33, %v988_v41 }
 0x10a   : > { %v1717_v11 = vmin.f32 %v1685_v12, 6.0  ;;  %v1231_v51 = vadd.f32 %v2798_v57, %v1134_v18  ;;  %v1022_v30 = vmul.f32 %v2503_v43, %v989_v1  ;;  %v1310_v63 = vmul.f32 %v2535_v3, %v988_v41  ;;  %v2902_v53 = vpop.f32.mrf.mxu3 }
 0x10b   : > { %v1439_v28 = vadd.f32 %v1407_v36, %v1341_v56  ;;  %v1521_v45 = vadd.f32 %v2801_v29, %v1424_v44  ;;  %v1149_v62 = vadd.f32 %v1117_v58, %v1052_v40  ;;  %v1632_v20 = vadd.f32 %v1600_v7, %v1535_v19 }
 0x10c   : > { %1749 = vst [vmem:[%s2634_s29 + $0x28] sm:$0xff] %v1717_v11  ;;  %v1103_v24 = vmul.f32 %v2511_v50, %v781_v16  ;;  %v2889_v42 = vadd.f32 %v1021_v32, %v956_v59  ;;  %v2891_v31 = vadd.f32 %v1022_v30, %v957_v54  ;;  %v1601_v17 = vmul.f32 %v2558_v33, %v989_v1  ;;  %v975_v59 = vld [vmem:[#allocation2 + $0x82] sm:$0xff] }
 0x10d   : > { %v1536_v57 = vadd.f32 %v2815_v15, %v1439_v28  ;;  %v1311_v56 = vmul.f32 %v2535_v3, %v989_v1  ;;  %v1668_v55 = vadd.f32 %v2571_v48, %v1632_v20  ;;  %v814_v40 = vmul.f32 %v2487_v35, %v781_v16  ;;  %v508_v15 = vpop.f32.mrf.mxu0 }
 0x10e   : > { %v1135_v29 = vadd.f32 %v1103_v24, %v1038_v0  ;;  %v2898_v58 = vadd.f32 %v1310_v63, %v1245_v52  ;;  %v1393_v37 = vmul.f32 %v2538_v5, %v781_v16  ;;  %v1586_v9 = vmul.f32 %v2558_v33, %v974_v39 }
 0x10f   : > { %v1633_v21 = vadd.f32 %v1601_v17, %v1536_v57  ;;  %v1246_v41 = vadd.f32 %v2812_v61, %v1149_v62  ;;  %v1700_v4 = vmax.f32 %v1668_v55, 0.0  ;;  %v1007_v1 = vmul.f32 %v2503_v43, %v974_v39 }
 0x110   : > { %v663_v6 = vpop.f32.mrf.mxu2  ;;  %v658_v18 = vadd.f32 %v2820_v34, %v2705_v60  ;;  %v1425_v12 = vadd.f32 %v1393_v37, %v1327_v25  ;;  %v1618_v44 = vadd.f32 %v1586_v9, %v1521_v45  ;;  %v616_v54 = vadd.f32 %v2829_v27, %v2809_v8 }
 0x111   : > { %v621_v47 = vpop.f32.mrf.mxu1  ;;  %v1669_v0 = vadd.f32 %v2571_v48, %v1633_v21  ;;  %v1732_v32 = vmin.f32 %v1700_v4, 6.0  ;;  %v943_v36 = vadd.f32 %v2818_v14, %v814_v40  ;;  %v1232_v61 = vadd.f32 %v2824_v26, %v1135_v29  ;;  %v3365_v21 = vld [vmem:[#allocation34_spill] sm:$0xff] }
 0x112   : > { %v1296_v16 = vmul.f32 %v2535_v3, %v974_v39  ;;  %760 = vst [vmem:[#allocation2 + $0x139] sm:$0xff] %v658_v18  ;;  %v1522_v52 = vadd.f32 %v2827_v10, %v1425_v12  ;;  %v1587_v60 = vmul.f32 %v2558_v33, %v975_v59  ;;  %v1654_v34 = vadd.f32 %v2571_v48, %v1618_v44  ;;  %v2941_v55 = vpop.f32.mrf.mxu3 }
 0x113   : > { %v1701_v11 = vmax.f32 %v1669_v0, 0.0  ;;  %746 = vst [vmem:[#allocation2 + $0x91] sm:$0xff] %v616_v54  ;;  %v2917_v25 = vadd.f32 %v1311_v56, %v1246_v41  ;;  %v1008_v27 = vmul.f32 %v2503_v43, %v975_v59  ;;  %v1297_v8 = vmul.f32 %v2535_v3, %v975_v59 }
 0x114   : > { %1764 = vst [vmem:[%s2634_s29 + $0xa0] sm:$0xff] %v1732_v32  ;;  %v661_v26 = vadd.f32 %v2857_v23, %v2747_v49  ;;  %v1619_v19 = vadd.f32 %v1587_v60, %v1522_v52  ;;  %v1686_v7 = vmax.f32 %v1654_v34, 0.0  ;;  %v619_v10 = vadd.f32 %v2861_v2, %v2867_v22  ;;  %v3363_v2 = vld [vmem:[#allocation8_spill] sm:$0xff] }
 0x115   : > { %v1733_v14 = vmin.f32 %v1701_v11, 6.0  ;;  %v1039_v30 = vadd.f32 %v1007_v1, %v2875_v13  ;;  %v2927_v63 = vadd.f32 %v1008_v27, %v943_v36  ;;  %v1328_v28 = vadd.f32 %v1296_v16, %v1231_v51  ;;  %v3364_v13 = vld [vmem:[#allocation9_spill] sm:$0xff]  ;;  %v511_v40 = vpop.f32.mrf.mxu0 }
 0x116   : > { %761 = vst [vmem:[#allocation2 + $0x141] sm:$0xff] %v661_v26  ;;  %v664_v45 = vadd.f32 %v663_v6, %v2803_v46  ;;  %v2931_v20 = vadd.f32 %v1297_v8, %v1232_v61  ;;  %v1655_v49 = vadd.f32 %v2571_v48, %v1619_v19  ;;  %v1718_v23 = vmin.f32 %v1686_v7, 6.0 }
 0x117   : > { %1765 = vst [vmem:[%s2634_s29 + $0xa8] sm:$0xff] %v1733_v14  ;;  %v926_v39 = vmul.f32 %v2494_v38, %v658_v18  ;;  %v1215_v22 = vmul.f32 %v3363_v2, %v658_v18  ;;  %v1505_v57 = vmul.f32 %v3364_v13, %v658_v18  ;;  %v912_v51 = vmul.f32 %v2494_v38, %v616_v54 }
 0x118   : > { %v666_v62 = vpop.f32.mrf.mxu2  ;;  %v1201_v17 = vmul.f32 %v3363_v2, %v616_v54  ;;  %747 = vst [vmem:[#allocation2 + $0x99] sm:$0xff] %v619_v10  ;;  %v1687_v46 = vmax.f32 %v1655_v49, 0.0  ;;  %v1491_v56 = vmul.f32 %v3364_v13, %v616_v54  ;;  %v2943_v29 = vadd.f32 %v621_v47, %v508_v15 }
 0x119   : > { %v624_v24 = vpop.f32.mrf.mxu1  ;;  %1750 = vst [vmem:[%s2634_s29 + $0x30] sm:$0xff] %v1718_v23  ;;  %v796_v6 = vld [vmem:[#allocation2 + $0x138] sm:$0xff]  ;;  %v2946_v37 = vadd.f32 %v666_v62, %v3365_v21  ;;  %v927_v59 = vmul.f32 %v2494_v38, %v661_v26  ;;  %v1216_v44 = vmul.f32 %v3363_v2, %v661_v26  ;;  %v1506_v54 = vmul.f32 %v3364_v13, %v661_v26 }
 0x11a   : > { %v1118_v9 = vmul.f32 %v2511_v50, %v796_v6  ;;  %v1408_v41 = vmul.f32 %v2538_v5, %v796_v6  ;;  %v782_v4 = vld [vmem:[#allocation2 + $0x90] sm:$0xff]  ;;  %762 = vst [vmem:[#allocation2 + $0x151] sm:$0xff] %v664_v45  ;;  %v2951_v1 = vadd.f32 %v624_v24, %v511_v40  ;;  %v1719_v18 = vmin.f32 %v1687_v46, 6.0 }
 0x11b   : > { %v829_v0 = vmul.f32 %v2487_v35, %v796_v6  ;;  %v1104_v47 = vmul.f32 %v2511_v50, %v782_v4  ;;  %v1394_v15 = vmul.f32 %v2538_v5, %v782_v4  ;;  %748 = vst [vmem:[#allocation2 + $0xa9] sm:$0xff] %v2943_v29  ;;  %v815_v12 = vmul.f32 %v2487_v35, %v782_v4 }
 0x11c   : > { %v913_v32 = vmul.f32 %v2494_v38, %v619_v10  ;;  %763 = vst [vmem:[#allocation2 + $0x159] sm:$0xff] %v2946_v37  ;;  %v1440_v36 = vadd.f32 %v1408_v41, %v2898_v58  ;;  %v2965_v11 = vmul.f32 %v3363_v2, %v619_v10  ;;  %v1492_v52 = vmul.f32 %v3364_v13, %v619_v10 }
 0x11d   : > { %1751 = vst [vmem:[%s2634_s29 + $0x38] sm:$0xff] %v1719_v18  ;;  %v797_v61 = vld [vmem:[#allocation2 + $0x140] sm:$0xff]  ;;  %v2969_v60 = vmul.f32 %v2494_v38, %v664_v45  ;;  %v1150_v34 = vadd.f32 %v1118_v9, %v2889_v42  ;;  %v1136_v27 = vadd.f32 %v1104_v47, %v1039_v30  ;;  %v1426_v8 = vadd.f32 %v1394_v15, %v1328_v28 }
 0x11e   : > { %v990_v16 = vld [vmem:[#allocation2 + $0x13a] sm:$0xff]  ;;  %v2973_v26 = vmul.f32 %v3363_v2, %v664_v45  ;;  %749 = vst [vmem:[#allocation2 + $0xb1] sm:$0xff] %v2951_v1  ;;  %v958_v58 = vadd.f32 %v926_v39, %v829_v0  ;;  %v830_v14 = vmul.f32 %v2487_v35, %v797_v61  ;;  %v1119_v19 = vmul.f32 %v2511_v50, %v797_v61  ;;  %v991_v62 = vld [vmem:[#allocation2 + $0x142] sm:$0xff]  ;;  %v2998_v0 = vpop.f32.mrf.mxu3 }
 0x11f   : > { %v2979_v7 = vmul.f32 %v3364_v13, %v664_v45  ;;  %v2981_v10 = vadd.f32 %v912_v51, %v815_v12  ;;  %v1023_v42 = vmul.f32 %v2503_v43, %v990_v16  ;;  %v2986_v30 = vmul.f32 %v2494_v38, %v2943_v29  ;;  %v783_v24 = vld [vmem:[#allocation2 + $0x98] sm:$0xff] }
 0x120   : > { %v2990_v28 = vmul.f32 %v3363_v2, %v2943_v29  ;;  %v1537_v49 = vadd.f32 %v1505_v57, %v1440_v36  ;;  %v1312_v23 = vmul.f32 %v2535_v3, %v990_v16  ;;  %v1409_v39 = vmul.f32 %v2538_v5, %v797_v61  ;;  %v976_v18 = vld [vmem:[#allocation2 + $0x92] sm:$0xff]  ;;  %v977_v57 = vld [vmem:[#allocation2 + $0x9a] sm:$0xff] }
 0x121   : > { %v1602_v45 = vmul.f32 %v2558_v33, %v990_v16  ;;  %v1247_v51 = vadd.f32 %v1215_v22, %v1150_v34  ;;  %v1233_v46 = vadd.f32 %v1201_v17, %v1136_v27  ;;  %v1523_v6 = vadd.f32 %v1491_v56, %v1426_v8  ;;  %v798_v36 = vld [vmem:[#allocation2 + $0x150] sm:$0xff] }
 0x122   : > { %v1151_v40 = vadd.f32 %v1119_v19, %v2891_v31  ;;  %v959_v21 = vadd.f32 %v927_v59, %v830_v14  ;;  %v1024_v9 = vmul.f32 %v2503_v43, %v991_v62  ;;  %v1441_v41 = vadd.f32 %v1409_v39, %v2917_v25 }
 0x123   : > { %v1634_v4 = vadd.f32 %v1602_v45, %v1537_v49  ;;  %v1055_v47 = vadd.f32 %v1023_v42, %v958_v58  ;;  %v1313_v15 = vmul.f32 %v2535_v3, %v991_v62  ;;  %v816_v12 = vmul.f32 %v2487_v35, %v783_v24  ;;  %v784_v45 = vld [vmem:[#allocation2 + $0xa8] sm:$0xff] }
 0x124   : > { %v1105_v22 = vmul.f32 %v2511_v50, %v783_v24  ;;  %v1344_v17 = vadd.f32 %v1312_v23, %v1247_v51  ;;  %v1538_v56 = vadd.f32 %v1506_v54, %v1441_v41  ;;  %v1603_v31 = vmul.f32 %v2558_v33, %v991_v62 }
 0x125   : > { %v1670_v59 = vadd.f32 %v2571_v48, %v1634_v4  ;;  %v1248_v25 = vadd.f32 %v1216_v44, %v1151_v40  ;;  %v1009_v61 = vmul.f32 %v2503_v43, %v976_v18  ;;  %v1010_v16 = vmul.f32 %v2503_v43, %v977_v57 }
 0x126   : > { %v1395_v34 = vmul.f32 %v2538_v5, %v783_v24  ;;  %v1635_v27 = vadd.f32 %v1603_v31, %v1538_v56  ;;  %v1137_v58 = vadd.f32 %v1105_v22, %v2927_v63  ;;  %v1588_v14 = vmul.f32 %v2558_v33, %v976_v18  ;;  %v3015_v24 = vpop.f32.mrf.mxu0 }
 0x127   : > { %v1702_v8 = vmax.f32 %v1670_v59, 0.0  ;;  %v945_v54 = vadd.f32 %v913_v32, %v816_v12  ;;  %v1298_v19 = vmul.f32 %v2535_v3, %v976_v18  ;;  %v1120_v44 = vmul.f32 %v2511_v50, %v798_v36  ;;  %v799_v59 = vld [vmem:[#allocation2 + $0x158] sm:$0xff] }
 0x128   : > { %v1427_v62 = vadd.f32 %v1395_v34, %v2931_v20  ;;  %v1671_v42 = vadd.f32 %v2571_v48, %v1635_v27  ;;  %v1620_v23 = vadd.f32 %v1588_v14, %v1523_v6  ;;  %v1410_v39 = vmul.f32 %v2538_v5, %v798_v36 }
 0x129   : > { %v1734_v49 = vmin.f32 %v1702_v8, 6.0  ;;  %v1299_v63 = vmul.f32 %v2535_v3, %v977_v57  ;;  %v1589_v32 = vmul.f32 %v2558_v33, %v977_v57  ;;  %v1152_v40 = vadd.f32 %v1120_v44, %v1055_v47 }
 0x12a   : > { %v1524_v51 = vadd.f32 %v1492_v52, %v1427_v62  ;;  %v1703_v41 = vmax.f32 %v1671_v42, 0.0  ;;  %v1234_v20 = vadd.f32 %v2965_v11, %v1137_v58  ;;  %v1656_v4 = vadd.f32 %v2571_v48, %v1620_v23  ;;  %v3027_v11 = vpop.f32.mrf.mxu3  ;;  %v992_v23 = vld [vmem:[#allocation2 + $0x152] sm:$0xff] }
 0x12b   : > { %1766 = vst [vmem:[%s2634_s29 + $0xb0] sm:$0xff] %v1734_v49  ;;  %v831_v6 = vmul.f32 %v2487_v35, %v798_v36  ;;  %v1249_v12 = vadd.f32 %v2973_v26, %v1152_v40  ;;  %v1442_v22 = vadd.f32 %v1410_v39, %v1344_v17  ;;  %v817_v56 = vmul.f32 %v2487_v35, %v784_v45 }
 0x12c   : > { %v1621_v18 = vadd.f32 %v1589_v32, %v1524_v51  ;;  %v1735_v31 = vmin.f32 %v1703_v41, 6.0  ;;  %v1688_v52 = vmax.f32 %v1656_v4, 0.0  ;;  %v1106_v57 = vmul.f32 %v2511_v50, %v784_v45  ;;  %v669_v32 = vpop.f32.mrf.mxu2 }
 0x12d   : > { %v1396_v47 = vmul.f32 %v2538_v5, %v784_v45  ;;  %v1056_v34 = vadd.f32 %v1024_v9, %v959_v21  ;;  %v1345_v27 = vadd.f32 %v1313_v15, %v1248_v25  ;;  %v1041_v36 = vadd.f32 %v1009_v61, %v2981_v10 }
 0x12e   : > { %v1657_v8 = vadd.f32 %v2571_v48, %v1621_v18  ;;  %1767 = vst [vmem:[%s2634_s29 + $0xb8] sm:$0xff] %v1735_v31  ;;  %v1042_v26 = vadd.f32 %v1010_v16, %v945_v54  ;;  %v1330_v17 = vadd.f32 %v1298_v19, %v1233_v46  ;;  %v1331_v58 = vadd.f32 %v1299_v63, %v1234_v20  ;;  %v785_v19 = vld [vmem:[#allocation2 + $0xb0] sm:$0xff]  ;;  %v517_v39 = vpop.f32.mrf.mxu0 }
 0x12f   : > { %v1720_v14 = vmin.f32 %v1688_v52, 6.0  ;;  %v960_v44 = vadd.f32 %v2969_v60, %v831_v6  ;;  %v1539_v42 = vadd.f32 %v2979_v7, %v1442_v22  ;;  %v832_v49 = vmul.f32 %v2487_v35, %v799_v59  ;;  %v993_v7 = vld [vmem:[#allocation2 + $0x15a] sm:$0xff] }
 0x130   : > { %v1689_v62 = vmax.f32 %v1657_v8, 0.0  ;;  %v3037_v21 = vadd.f32 %v2986_v30, %v817_v56  ;;  %v1138_v10 = vadd.f32 %v1106_v57, %v1041_v36  ;;  %v1428_v48 = vadd.f32 %v1396_v47, %v1330_v17  ;;  %v978_v56 = vld [vmem:[#allocation2 + $0xaa] sm:$0xff]  ;;  %v3069_v57 = vld [vmem:[%s3326_s5] ss:$0 sm:$0xff] }
 0x131   : > { %1752 = vst [vmem:[%s2634_s29 + $0x40] sm:$0xff] %v1720_v14  ;;  %v1121_v9 = vmul.f32 %v2511_v50, %v799_v59  ;;  %v1493_v15 = vmul.f32 %v3364_v13, %v2943_v29  ;;  %v929_v60 = vmul.f32 %v2494_v38, %v2946_v37  ;;  %v1411_v25 = vmul.f32 %v2538_v5, %v799_v59 }
 0x132   : > { %v1721_v46 = vmin.f32 %v1689_v62, 6.0  ;;  %v1025_v61 = vmul.f32 %v2503_v43, %v992_v23  ;;  %v1218_v30 = vmul.f32 %v3363_v2, %v2946_v37  ;;  %v1604_v54 = vmul.f32 %v2558_v33, %v992_v23  ;;  %v3058_v33 = vld [vmem:[%s3325_s4 + $0x8] ss:$0 sm:$0xff]  ;;  %v675_v59 = vpop.f32.mrf.mxu3 }
 0x133   : > { %v1153_v16 = vadd.f32 %v1121_v9, %v1056_v34  ;;  %v961_v45 = vadd.f32 %v929_v60, %v832_v49  ;;  %v1314_v29 = vmul.f32 %v2535_v3, %v992_v23  ;;  %v1443_v63 = vadd.f32 %v1411_v25, %v1345_v27  ;;  %v979_v23 = vld [vmem:[#allocation2 + $0xb2] sm:$0xff] }
 0x134   : > { %1753 = vst [vmem:[%s2634_s29 + $0x48] sm:$0xff] %v1721_v46  ;;  %v1508_v51 = vmul.f32 %v3364_v13, %v2946_v37  ;;  %v1235_v40 = vadd.f32 %v2990_v28, %v1138_v10  ;;  %v1026_v41 = vmul.f32 %v2503_v43, %v993_v7  ;;  %v1636_v4 = vadd.f32 %v1604_v54, %v1539_v42 }
 0x135   : > { %v1250_v20 = vadd.f32 %v1218_v30, %v1153_v16  ;;  %v1605_v18 = vmul.f32 %v3058_v33, %v993_v7  ;;  %v818_v22 = vmul.f32 %v2487_v35, %v785_v19  ;;  %v1107_v37 = vmul.f32 %v2511_v50, %v785_v19  ;;  %v627_v16 = vpop.f32.mrf.mxu1 }
 0x136   : > { %v1540_v6 = vadd.f32 %v1508_v51, %v1443_v63  ;;  %v1525_v31 = vadd.f32 %v1493_v15, %v1428_v48  ;;  %v3063_v52 = vadd.f32 %v1025_v61, %v960_v44  ;;  %v1315_v28 = vmul.f32 %v2535_v3, %v993_v7  ;;  %v3366_v15 = vld [vmem:[#allocation6_spill] sm:$0xff] }
 0x137   : > { %v1672_v47 = vadd.f32 %v3069_v57, %v1636_v4  ;;  %v3072_v34 = vadd.f32 %v1026_v41, %v961_v45  ;;  %v3074_v27 = vadd.f32 %v1314_v29, %v1249_v12  ;;  %v915_v8 = vmul.f32 %v2494_v38, %v2951_v1  ;;  %v520_v45 = vpop.f32.mrf.mxu0 }
 0x138   : > { %v1637_v36 = vadd.f32 %v1605_v18, %v1540_v6  ;;  %v1011_v14 = vmul.f32 %v2503_v43, %v978_v56  ;;  %v1139_v62 = vadd.f32 %v1107_v37, %v1042_v26  ;;  %v1397_v44 = vmul.f32 %v2538_v5, %v785_v19 }
 0x139   : > { %v1704_v17 = vmax.f32 %v1672_v47, 0.0  ;;  %v947_v49 = vadd.f32 %v915_v8, %v818_v22  ;;  %v1204_v10 = vmul.f32 %v3363_v2, %v2951_v1  ;;  %v1590_v12 = vmul.f32 %v3058_v33, %v978_v56 }
 0x13a   : > { %v1673_v42 = vadd.f32 %v3069_v57, %v1637_v36  ;;  %v1429_v9 = vadd.f32 %v1397_v44, %v1331_v58  ;;  %v1494_v46 = vmul.f32 %v3364_v13, %v2951_v1  ;;  %v631_v60 = vadd.f32 %v3366_v15, %v517_v39 }
 0x13b   : > { %v1736_v48 = vmin.f32 %v1704_v17, 6.0  ;;  %v1300_v7 = vmul.f32 %v2535_v3, %v978_v56  ;;  %v1622_v25 = vadd.f32 %v1590_v12, %v1525_v31  ;;  %v670_v61 = vadd.f32 %v669_v32, %v2902_v53  ;;  %v672_v53 = vpop.f32.mrf.mxu2 }
 0x13c   : > { %v1705_v26 = vmax.f32 %v1673_v42, 0.0  ;;  %v1012_v30 = vmul.f32 %v2503_v43, %v979_v23  ;;  %v1236_v54 = vadd.f32 %v1204_v10, %v1139_v62  ;;  %v1526_v19 = vadd.f32 %v1494_v46, %v1429_v9  ;;  %751 = vst [vmem:[#allocation2 + $0xc9] sm:$0xff] %v631_v60 }
 0x13d   : > { %1768 = vst [vmem:[%s2634_s29 + $0xc0] sm:$0xff] %v1736_v48  ;;  %v1591_v58 = vmul.f32 %v3058_v33, %v979_v23  ;;  %v3092_v29 = vadd.f32 %v1315_v28, %v1250_v20  ;;  %v3095_v39 = vadd.f32 %v1011_v14, %v3037_v21  ;;  %v1658_v63 = vadd.f32 %v3069_v57, %v1622_v25  ;;  %v3367_v21 = vld [vmem:[#allocation7_spill] sm:$0xff]  ;;  %v678_v28 = vpop.f32.mrf.mxu3 }
 0x13e   : > { %v1737_v1 = vmin.f32 %v1705_v26, 6.0  ;;  %v1301_v51 = vmul.f32 %v2535_v3, %v979_v23  ;;  %764 = vst [vmem:[#allocation2 + $0x169] sm:$0xff] %v670_v61  ;;  %v628_v41 = vadd.f32 %v627_v16, %v3015_v24  ;;  %v676_v4 = vadd.f32 %v675_v59, %v2998_v0 }
 0x13f   : > { %v1623_v32 = vadd.f32 %v1591_v58, %v1526_v19  ;;  %v3102_v6 = vadd.f32 %v1012_v30, %v947_v49  ;;  %v3104_v20 = vadd.f32 %v1300_v7, %v1235_v40  ;;  %v1690_v18 = vmax.f32 %v1658_v63, 0.0 }
 0x140   : > { %1769 = vst [vmem:[%s2634_s29 + $0xc8] sm:$0xff] %v1737_v1  ;;  %v634_v22 = vadd.f32 %v3367_v21, %v520_v45  ;;  %v3107_v56 = vadd.f32 %v1301_v51, %v1236_v54  ;;  %v917_v31 = vmul.f32 %v2494_v38, %v631_v60  ;;  %v673_v24 = vadd.f32 %v672_v53, %v2941_v55 }
 0x141   : > { %v1659_v37 = vadd.f32 %v3069_v57, %v1623_v32  ;;  %750 = vst [vmem:[#allocation2 + $0xc1] sm:$0xff] %v628_v41  ;;  %v1722_v0 = vmin.f32 %v1690_v18, 6.0  ;;  %v3113_v47 = vmul.f32 %v3363_v2, %v631_v60  ;;  %v3116_v40 = vmul.f32 %v3364_v13, %v631_v60 }
 0x142   : > { %v930_v59 = vmul.f32 %v2494_v38, %v670_v61  ;;  %766 = vst [vmem:[#allocation2 + $0x181] sm:$0xff] %v676_v4  ;;  %v1219_v8 = vmul.f32 %v3363_v2, %v670_v61  ;;  %v1509_v17 = vmul.f32 %v3364_v13, %v670_v61  ;;  %v916_v14 = vmul.f32 %v2494_v38, %v628_v41 }
 0x143   : > { %v1691_v36 = vmax.f32 %v1659_v37, 0.0  ;;  %752 = vst [vmem:[#allocation2 + $0xd9] sm:$0xff] %v634_v22  ;;  %v1205_v55 = vmul.f32 %v3363_v2, %v628_v41  ;;  %v1495_v62 = vmul.f32 %v3364_v13, %v628_v41  ;;  %v3126_v44 = vmul.f32 %v3363_v2, %v676_v4  ;;  %v981_v23 = vld [vmem:[#allocation2 + $0xca] sm:$0xff] }
 0x144   : > { %1754 = vst [vmem:[%s2634_s29 + $0x50] sm:$0xff] %v1722_v0  ;;  %v679_v42 = vadd.f32 %v678_v28, %v3027_v11  ;;  %v3130_v10 = vmul.f32 %v3364_v13, %v676_v4  ;;  %v918_v12 = vmul.f32 %v2494_v38, %v634_v22  ;;  %v3134_v48 = vmul.f32 %v3363_v2, %v634_v22 }
 0x145   : > { %v1723_v49 = vmin.f32 %v1691_v36, 6.0  ;;  %765 = vst [vmem:[#allocation2 + $0x171] sm:$0xff] %v673_v24  ;;  %v800_v9 = vld [vmem:[#allocation2 + $0x168] sm:$0xff]  ;;  %v3137_v46 = vmul.f32 %v3364_v13, %v634_v22  ;;  %v3140_v15 = vmul.f32 %v2494_v38, %v673_v24  ;;  %v3143_v11 = vmul.f32 %v3363_v2, %v673_v24 }
 0x146   : > { %v3146_v60 = vmul.f32 %v3364_v13, %v673_v24  ;;  %767 = vst [vmem:[#allocation2 + $0x189] sm:$0xff] %v679_v42  ;;  %v1014_v26 = vmul.f32 %v2503_v43, %v981_v23  ;;  %v833_v7 = vmul.f32 %v2487_v35, %v800_v9  ;;  %v1122_v25 = vmul.f32 %v2511_v50, %v800_v9 }
 0x147   : > { %1755 = vst [vmem:[%s2634_s29 + $0x58] sm:$0xff] %v1723_v49  ;;  %v1412_v61 = vmul.f32 %v2538_v5, %v800_v9  ;;  %v1303_v16 = vmul.f32 %v2535_v3, %v981_v23  ;;  %v1593_v38 = vmul.f32 %v3058_v33, %v981_v23  ;;  %v3156_v58 = vmul.f32 %v3363_v2, %v679_v42 }
 0x148   : > { %v786_v30 = vld [vmem:[#allocation2 + $0xc0] sm:$0xff]  ;;  %v787_v54 = vld [vmem:[#allocation2 + $0xc8] sm:$0xff]  ;;  %v3159_v45 = vmul.f32 %v3364_v13, %v679_v42  ;;  %v3161_v1 = vadd.f32 %v930_v59, %v833_v7  ;;  %v1154_v63 = vadd.f32 %v1122_v25, %v3063_v52 }
 0x149   : > { %v980_v19 = vld [vmem:[#allocation2 + $0xc2] sm:$0xff]  ;;  %v1444_v53 = vadd.f32 %v1412_v61, %v3074_v27  ;;  %v819_v51 = vmul.f32 %v2487_v35, %v786_v30  ;;  %v820_v32 = vmul.f32 %v2487_v35, %v787_v54  ;;  %v1108_v4 = vmul.f32 %v2511_v50, %v786_v30 }
 0x14a   : > { %v1013_v41 = vmul.f32 %v2503_v43, %v980_v19  ;;  %v1109_v2 = vmul.f32 %v2511_v50, %v787_v54  ;;  %v1091_v18 = vld [vmem:[#allocation2 + $0x180] sm:$0xff]  ;;  %v3170_v21 = vadd.f32 %v1219_v8, %v1154_v63  ;;  %v1302_v52 = vmul.f32 %v2535_v3, %v980_v19  ;;  %v788_v59 = vld [vmem:[#allocation2 + $0xd8] sm:$0xff] }
 0x14b   : > { %v3172_v22 = vadd.f32 %v1509_v17, %v1444_v53  ;;  %v948_v37 = vadd.f32 %v916_v14, %v819_v51  ;;  %v949_v24 = vadd.f32 %v917_v31, %v820_v32  ;;  %v1140_v27 = vadd.f32 %v1108_v4, %v3095_v39  ;;  %v789_v36 = vld [vmem:[#allocation2 + $0xe0] sm:$0xff] }
 0x14c   : > { %v1141_v28 = vadd.f32 %v1109_v2, %v3102_v6  ;;  %v1398_v0 = vmul.f32 %v2538_v5, %v786_v30  ;;  %v982_v42 = vld [vmem:[#allocation2 + $0xda] sm:$0xff]  ;;  %v1399_v23 = vmul.f32 %v2538_v5, %v787_v54  ;;  %v1592_v8 = vmul.f32 %v3058_v33, %v980_v19 }
 0x14d   : > { %v1045_v49 = vadd.f32 %v1013_v41, %v948_v37  ;;  %v3181_v17 = vmul.f32 %v2511_v50, %v1091_v18  ;;  %v1237_v14 = vadd.f32 %v1205_v55, %v1140_v27  ;;  %v3186_v6 = vmul.f32 %v2538_v5, %v1091_v18  ;;  %v3369_v37 = vld [vmem:[#allocation13_spill] sm:$0xff] }
 0x14e   : > { %v1238_v31 = vadd.f32 %v3113_v47, %v1141_v28  ;;  %v1430_v39 = vadd.f32 %v1398_v0, %v3104_v20  ;;  %v1431_v9 = vadd.f32 %v1399_v23, %v3107_v56  ;;  %v821_v7 = vmul.f32 %v2487_v35, %v788_v59  ;;  %v3368_v20 = vld [vmem:[#allocation10_spill] sm:$0xff]  ;;  %v3370_v28 = vld [vmem:[#allocation20_spill] sm:$0xff] }
 0x14f   : > { %v822_v25 = vmul.f32 %v2487_v35, %v789_v36  ;;  %v1015_v61 = vmul.f32 %v2503_v43, %v982_v42  ;;  %v1334_v30 = vadd.f32 %v1302_v52, %v1237_v14  ;;  %v1046_v19 = vadd.f32 %v1014_v26, %v949_v24 }
 0x150   : > { %v1527_v54 = vadd.f32 %v1495_v62, %v1430_v39  ;;  %v1110_v55 = vmul.f32 %v2511_v50, %v788_v59  ;;  %v1528_v47 = vadd.f32 %v3116_v40, %v1431_v9  ;;  %v950_v63 = vadd.f32 %v918_v12, %v821_v7  ;;  %v3373_v7 = vld [vmem:[#allocation16_spill] sm:$0xff] }
 0x151   : > { %v951_v53 = vadd.f32 %v3368_v20, %v822_v25  ;;  %v1111_v51 = vmul.f32 %v2511_v50, %v789_v36  ;;  %v1304_v41 = vmul.f32 %v2535_v3, %v982_v42  ;;  %v1335_v4 = vadd.f32 %v1303_v16, %v1238_v31  ;;  %v3372_v16 = vld [vmem:[#allocation11_spill] sm:$0xff]  ;;  %v3374_v25 = vld [vmem:[#allocation18_spill] sm:$0xff]  ;;  %v3377_v20 = vld [vmem:[#allocation12_spill] sm:$0xff] }
 0x152   : > { %v1624_v32 = vadd.f32 %v1592_v8, %v1527_v54  ;;  %v1142_v56 = vadd.f32 %v1110_v55, %v1045_v49  ;;  %v1625_v2 = vadd.f32 %v1593_v38, %v1528_v47  ;;  %v1047_v18 = vadd.f32 %v1015_v61, %v950_v63  ;;  %v3371_v49 = vld [vmem:[#allocation22_spill] sm:$0xff]  ;;  %v3376_v55 = vld [vmem:[#allocation21_spill] sm:$0xff] }
 0x153   : > { %v1048_v52 = vadd.f32 %v3369_v37, %v951_v53  ;;  %v1143_v62 = vadd.f32 %v1111_v51, %v1046_v19  ;;  %v1400_v40 = vmul.f32 %v2538_v5, %v788_v59  ;;  %v1401_v12 = vmul.f32 %v2538_v5, %v789_v36  ;;  %v3375_v61 = vld [vmem:[#allocation14_spill] sm:$0xff]  ;;  %v3381_v37 = vld [vmem:[#allocation17_spill] sm:$0xff] }
 0x154   : > { %v1660_v26 = vadd.f32 %v3069_v57, %v1624_v32  ;;  %v1239_v24 = vadd.f32 %v3134_v48, %v1142_v56  ;;  %v1661_v27 = vadd.f32 %v3069_v57, %v1625_v2  ;;  %v1144_v0 = vadd.f32 %v3370_v28, %v1047_v18  ;;  %v801_v54 = vld [vmem:[#allocation2 + $0x170] sm:$0xff]  ;;  %v3378_v32 = vld [vmem:[#allocation23_spill] sm:$0xff]  ;;  %v3380_v2 = vld [vmem:[#allocation25_spill] sm:$0xff] }
 0x155   : > { %v1145_v23 = vadd.f32 %v3371_v49, %v1048_v52  ;;  %v1240_v38 = vadd.f32 %v3372_v16, %v1143_v62  ;;  %v1432_v31 = vadd.f32 %v1400_v40, %v1334_v30  ;;  %v1433_v39 = vadd.f32 %v1401_v12, %v1335_v4  ;;  %v994_v51 = vld [vmem:[#allocation2 + $0x16a] sm:$0xff]  ;;  %v3383_v12 = vld [vmem:[#allocation28_spill] sm:$0xff]  ;;  %v3384_v28 = vld [vmem:[#allocation31_spill] sm:$0xff] }
 0x156   : > { %v1692_v8 = vmax.f32 %v1660_v26, 0.0  ;;  %v1336_v14 = vadd.f32 %v1304_v41, %v1239_v24  ;;  %v1693_v9 = vmax.f32 %v1661_v27, 0.0  ;;  %v1241_v48 = vadd.f32 %v3373_v7, %v1144_v0  ;;  %v3379_v41 = vld [vmem:[#allocation24_spill] sm:$0xff]  ;;  %v3382_v26 = vld [vmem:[#allocation15_spill] sm:$0xff] }
 0x157   : > { %v1242_v59 = vadd.f32 %v3374_v25, %v1145_v23  ;;  %v1337_v36 = vadd.f32 %v3375_v61, %v1240_v38  ;;  %v1529_v63 = vadd.f32 %v3137_v46, %v1432_v31  ;;  %v1530_v53 = vadd.f32 %v3377_v20, %v1433_v39  ;;  %v995_v46 = vld [vmem:[#allocation2 + $0x172] sm:$0xff]  ;;  %v3387_v39 = vld [vmem:[#allocation29_spill] sm:$0xff] }
 0x158   : > { %v1724_v19 = vmin.f32 %v1692_v8, 6.0  ;;  %v1434_v47 = vadd.f32 %v3376_v55, %v1336_v14  ;;  %v1725_v30 = vmin.f32 %v1693_v9, 6.0  ;;  %v1338_v56 = vadd.f32 %v3378_v32, %v1241_v48  ;;  %v3385_v49 = vld [vmem:[#allocation19_spill] sm:$0xff]  ;;  %v3386_v8 = vld [vmem:[#allocation26_spill] sm:$0xff]  ;;  %v3391_v20 = vld [vmem:[#allocation33_spill] sm:$0xff] }
 0x159   : > { %v1339_v4 = vadd.f32 %v3379_v41, %v1242_v59  ;;  %v1435_v18 = vadd.f32 %v3380_v2, %v1337_v36  ;;  %v1594_v62 = vmul.f32 %v3058_v33, %v982_v42  ;;  %v1627_v24 = vadd.f32 %v3382_v26, %v1530_v53  ;;  %v3389_v48 = vld [vmem:[#allocation27_spill] sm:$0xff] }
 0x15a   : > { %1756 = vst [vmem:[%s2634_s29 + $0x60] sm:$0xff] %v1724_v19  ;;  %v1531_v52 = vadd.f32 %v3381_v37, %v1434_v47  ;;  %v834_v40 = vmul.f32 %v2487_v35, %v801_v54  ;;  %v1436_v27 = vadd.f32 %v3383_v12, %v1338_v56  ;;  %v1027_v16 = vmul.f32 %v2503_v43, %v994_v51  ;;  %v3388_v35 = vld [vmem:[#allocation30_spill] sm:$0xff]  ;;  %v3390_v47 = vld [vmem:[#allocation32_spill] sm:$0xff] }
 0x15b   : > { %1757 = vst [vmem:[%s2634_s29 + $0x68] sm:$0xff] %v1725_v30  ;;  %v1437_v0 = vadd.f32 %v3384_v28, %v1339_v4  ;;  %v1532_v23 = vadd.f32 %v3385_v49, %v1435_v18  ;;  %v1626_v38 = vadd.f32 %v1594_v62, %v1529_v63  ;;  %v1663_v31 = vadd.f32 %v3069_v57, %v1627_v24  ;;  %v1092_v24 = vld [vmem:[#allocation2 + $0x188] sm:$0xff] }
 0x15c   : > { %v1628_v14 = vadd.f32 %v3386_v8, %v1531_v52  ;;  %v963_v42 = vadd.f32 %v3140_v15, %v834_v40  ;;  %v1533_v9 = vadd.f32 %v3387_v39, %v1436_v27  ;;  %v1028_v59 = vmul.f32 %v2503_v43, %v995_v46  ;;  %v1480_v39 = vld [vmem:[#allocation2 + $0x199] sm:$0xff] }
 0x15d   : > { %v1534_v7 = vadd.f32 %v3388_v35, %v1437_v0  ;;  %v1629_v25 = vadd.f32 %v3389_v48, %v1532_v23  ;;  %v1662_v61 = vadd.f32 %v3069_v57, %v1626_v38  ;;  %v1695_v19 = vmax.f32 %v1663_v31, 0.0  ;;  %v1285_v23 = vld [vmem:[#allocation2 + $0x182] sm:$0xff] }
 0x15e   : > { %v1664_v36 = vadd.f32 %v3069_v57, %v1628_v14  ;;  %v1059_v55 = vadd.f32 %v1027_v16, %v3161_v1  ;;  %v1630_v63 = vadd.f32 %v3390_v47, %v1533_v9  ;;  %v1060_v30 = vadd.f32 %v1028_v59, %v963_v42  ;;  %v1286_v16 = vld [vmem:[#allocation2 + $0x18a] sm:$0xff]  ;;  %v1578_v47 = vld [vmem:[#allocation2 + $0x1a2] sm:$0xff] }
 0x15f   : > { %v1631_v15 = vadd.f32 %v3391_v20, %v1534_v7  ;;  %v1665_v53 = vadd.f32 %v3069_v57, %v1629_v25  ;;  %v1694_v32 = vmax.f32 %v1662_v61, 0.0  ;;  %v1727_v41 = vmin.f32 %v1695_v19, 6.0 }
 0x160   : > { %v1696_v56 = vmax.f32 %v1664_v36, 0.0  ;;  %v1123_v43 = vmul.f32 %v2511_v50, %v801_v54  ;;  %v1666_v4 = vadd.f32 %v3069_v57, %v1630_v63  ;;  %v1156_v1 = vadd.f32 %v3181_v17, %v1059_v55  ;;  %v1577_v36 = vld [vmem:[#allocation2 + $0x19a] sm:$0xff] }
 0x161   : > { %v1667_v2 = vadd.f32 %v3069_v57, %v1631_v15  ;;  %v1697_v18 = vmax.f32 %v1665_v53, 0.0  ;;  %v1726_v37 = vmin.f32 %v1694_v32, 6.0  ;;  %1759 = vst [vmem:[%s2634_s29 + $0x78] sm:$0xff] %v1727_v41  ;;  %v1316_v26 = vmul.f32 %v2535_v3, %v994_v51 }
 0x162   : > { %v1728_v52 = vmin.f32 %v1696_v56, 6.0  ;;  %v1155_v62 = vadd.f32 %v1123_v43, %v3072_v34  ;;  %v1698_v40 = vmax.f32 %v1666_v4, 0.0  ;;  %v1317_v28 = vmul.f32 %v2535_v3, %v995_v46 }
 0x163   : > { %v1699_v12 = vmax.f32 %v1667_v2, 0.0  ;;  %v1729_v27 = vmin.f32 %v1697_v18, 6.0  ;;  %1758 = vst [vmem:[%s2634_s29 + $0x70] sm:$0xff] %v1726_v37  ;;  %v1348_v17 = vadd.f32 %v1316_v26, %v3170_v21  ;;  %v1413_v49 = vmul.f32 %v2538_v5, %v801_v54 }
 0x164   : > { %v1252_v0 = vadd.f32 %v3143_v11, %v1155_v62  ;;  %v1606_v34 = vmul.f32 %v3058_v33, %v994_v51  ;;  %v1730_v38 = vmin.f32 %v1698_v40, 6.0  ;;  %1760 = vst [vmem:[%s2634_s29 + $0x80] sm:$0xff] %v1728_v52  ;;  %v1607_v14 = vmul.f32 %v3058_v33, %v995_v46  ;;  %v1481_v51 = vld [vmem:[#allocation2 + $0x1a1] sm:$0xff] }
 0x165   : > { %v1731_v8 = vmin.f32 %v1699_v12, 6.0  ;;  %v1125_v31 = vmul.f32 %v2511_v50, %v1092_v24  ;;  %1761 = vst [vmem:[%s2634_s29 + $0x88] sm:$0xff] %v1729_v27  ;;  %v1445_v11 = vadd.f32 %v1413_v49, %v3092_v29  ;;  %v1446_v21 = vadd.f32 %v3186_v6, %v1348_v17  ;;  %v2001_v6 = vld [vmem:[#allocation2] sm:$0xff] }
 0x166   : > { %v1349_v42 = vadd.f32 %v1317_v28, %v1252_v0  ;;  %v1638_v54 = vadd.f32 %v1606_v34, %v3172_v22  ;;  %1762 = vst [vmem:[%s2634_s29 + $0x90] sm:$0xff] %v1730_v38  ;;  %v1253_v35 = vadd.f32 %v3126_v44, %v1156_v1  ;;  %v1318_v7 = vmul.f32 %v2535_v3, %v1285_v23 }
 0x167   : > { %v1157_v9 = vadd.f32 %v1125_v31, %v1060_v30  ;;  %v1319_v46 = vmul.f32 %v2535_v3, %v1286_v16  ;;  %1763 = vst [vmem:[%s2634_s29 + $0x98] sm:$0xff] %v1731_v8  ;;  %v1542_v50 = vadd.f32 %v3146_v60, %v1445_v11  ;;  %v1415_v29 = vmul.f32 %v2538_v5, %v1092_v24 }
 0x168   : > { %v1674_v48 = vadd.f32 %v3069_v57, %v1638_v54  ;;  %v1416_v22 = vmul.f32 %v2001_v6, %v2538_v5  ;;  %v1350_v59 = vadd.f32 %v1318_v7, %v1253_v35  ;;  %v1513_v61 = vmul.f32 %v3364_v13, %v1480_v39 }
 0x169   : > { %v1254_v25 = vadd.f32 %v3156_v58, %v1157_v9  ;;  %v1514_v44 = vmul.f32 %v3364_v13, %v1481_v51  ;;  %v1639_v19 = vadd.f32 %v1607_v14, %v1542_v50  ;;  %v1447_v55 = vadd.f32 %v1415_v29, %v1349_v42 }
 0x16a   : > { %v1706_v3 = vmax.f32 %v1674_v48, 0.0  ;;  %v1543_v60 = vadd.f32 %v3130_v10, %v1446_v21  ;;  %v1448_v20 = vadd.f32 %v1416_v22, %v1350_v59  ;;  %v1608_v5 = vmul.f32 %v3058_v33, %v1285_v23 }
 0x16b   : > { %v1351_v63 = vadd.f32 %v1319_v46, %v1254_v25  ;;  %v1609_v58 = vmul.f32 %v3058_v33, %v1286_v16  ;;  %v1675_v15 = vadd.f32 %v3069_v57, %v1639_v19  ;;  %v1544_v13 = vadd.f32 %v3159_v45, %v1447_v55 }
 0x16c   : > { %v1738_v53 = vmin.f32 %v1706_v3, 6.0  ;;  %v1610_v30 = vmul.f32 %v3058_v33, %v1577_v36  ;;  %v1545_v56 = vadd.f32 %v1513_v61, %v1448_v20  ;;  %v1611_v10 = vmul.f32 %v3058_v33, %v1578_v47 }
 0x16d   : > { %v1449_v32 = vadd.f32 %v1416_v22, %v1351_v63  ;;  %v1640_v41 = vadd.f32 %v1608_v5, %v1543_v60  ;;  %v1707_v43 = vmax.f32 %v1675_v15, 0.0  ;;  %v1641_v4 = vadd.f32 %v1609_v58, %v1544_v13 }
 0x16e   : > { %1770 = vst [vmem:[%s2634_s29 + $0xd0] sm:$0xff] %v1738_v53  ;;  %v1642_v18 = vadd.f32 %v1610_v30, %v1545_v56 }
 0x16f   : > { %v1546_v2 = vadd.f32 %v1514_v44, %v1449_v32  ;;  %v1676_v1 = vadd.f32 %v3069_v57, %v1640_v41  ;;  %v1739_v37 = vmin.f32 %v1707_v43, 6.0  ;;  %v1677_v45 = vadd.f32 %v3069_v57, %v1641_v4 }
 0x170   : > { %v1678_v52 = vadd.f32 %v3069_v57, %v1642_v18 }
 0x171   : > { %v1643_v33 = vadd.f32 %v1611_v10, %v1546_v2  ;;  %v1708_v62 = vmax.f32 %v1676_v1, 0.0  ;;  %1771 = vst [vmem:[%s2634_s29 + $0xd8] sm:$0xff] %v1739_v37  ;;  %v1709_v26 = vmax.f32 %v1677_v45, 0.0 }
 0x172   : > { %v1710_v40 = vmax.f32 %v1678_v52, 0.0 }
 0x173   : > { %v1679_v24 = vadd.f32 %v3069_v57, %v1643_v33  ;;  %v1740_v12 = vmin.f32 %v1708_v62, 6.0  ;;  %v1741_v27 = vmin.f32 %v1709_v26, 6.0 }
 0x174   : > { %v1742_v0 = vmin.f32 %v1710_v40, 6.0 }
 0x175   : > { %v1711_v28 = vmax.f32 %v1679_v24, 0.0  ;;  %1772 = vst [vmem:[%s2634_s29 + $0xe0] sm:$0xff] %v1740_v12 }
 0x176   : > { %1773 = vst [vmem:[%s2634_s29 + $0xe8] sm:$0xff] %v1741_v27 }
 0x177   : > { %v1743_v17 = vmin.f32 %v1711_v28, 6.0  ;;  %1774 = vst [vmem:[%s2634_s29 + $0xf0] sm:$0xff] %v1742_v0 }
 0x179   : > { %1775 = vst [vmem:[%s2634_s29 + $0xf8] sm:$0xff] %v1743_v17 }
 0x17a   : > { %2029 = shalt.err (!%p2026_p3)
}
 0x17b   : > { %s2067_s26 = smov 128   ;;  %s2068_s29 = smov 8  }
 0x17c   : > { %1955 = dma.vmem_to_hbm [thread:$0]  (%p2142_p5), %s1790_s25, 4096, %s1792_s16, %s1777_s17, %s2067_s26, %s2067_s26, %s2068_s29  }
 0x17d PF: > { %p1961_p4 = scmp.ge.s32.totalorder %s2064_s24, 2  ;;  %s1806_s12 = sand.u32 1, %s2052_s21  }
 0x17e   : > { %s1807_s13 = scalar_lea.sflag [#allocation4], %s1806_s12 }
 0x17f   : > { %p1958_p7 = pnand %p1961_p4, %p2146_p6 }
 0x181   : > { %p1959_p8 = pneg %p1958_p7 }
 0x183   : > { %2047 = dma.done.wait (%p1959_p8), %s1807_s13, 4096  }
 0x184   : > { %2049 = vsyncadd (%p1959_p8), %s1807_s13, 4294963200  ;;  %p16_p9 = scmp.ge.s32.totalorder %s2129_s27, 4   ;;  %s3392_s21 = smov %s2056_s22 }
 0x185   : > { %s3393_s22 = smov %s2060_s23  ;;  %s3394_s23 = smov %s2140_s30 }
 0x186   : > { %s3395_s24 = smov %s2129_s27  ;;  %18 = sbr.rel (!%p16_p9) target bundleno = 3 (0x3), region = 84 }
 0x18b   :  { %1813 = vsyncpa [#allocation4], 1 }
 0x18c   :  { %1815 = vsyncpa [#allocation4 + $0x1], 1 }

</bundles_post_ra>
